<compile_context>
chip_gen: v6e
topology: v6e:2x2x1
jax: 0.10.0
libtpu: 0.0.40
codegen_flags: <defaults>
</compile_context>

<pallas_src>
import functools

import jax
import jax.numpy as jnp
from jax import lax
from jax.experimental import pallas as pl
from jax.experimental.pallas import tpu as pltpu

INPUT_SIZE = 28
HIDDEN = 64
OUT = 10

LANE = 128              # each gate occupies a full 128-lane span (aligned slices)
X_LANES = 64            # x staged at 64-lane width (28 real + 36 zero)
G4 = 4 * LANE           # 4 gates x 128 lanes


def _pick_t_tile(T, max_tile=256):
    """Largest divisor of T that is <= max_tile (falls back to T)."""
    for cand in range(min(T, max_tile), 0, -1):
        if T % cand == 0:
            return cand
    return T


def lstm_last_kernel(x_ref, wih_ref, b_ref, whh_ref, wout_ref, bout_ref,
                     o_ref, xg_sc, h_sc, c_sc, *, t_tile, b_pad):
    tt = pl.program_id(0)

    @pl.when(tt == 0)
    def _():
        h_sc[...] = jnp.zeros_like(h_sc)
        c_sc[...] = jnp.zeros_like(c_sc)

    # ---- Hoisted input projection: one batched MXU pass for the whole tile.
    # x block: [t_tile*B_pad, X_LANES] bf16, W_ih_pad: [X_LANES, G4] bf16.
    # The fused bias is folded in here so the recurrence never re-broadcasts it.
    xg = jnp.dot(x_ref[...], wih_ref[...], preferred_element_type=jnp.float32)
    xg_sc[...] = xg + b_ref[...]                     # [t_tile*B_pad, G4] f32

    w_hh = whh_ref[...]                              # [LANE, G4] bf16, loaded once

    def step(t, carry):
        h, c = carry                                 # [B_pad, LANE] f32 each
        row = pl.multiple_of(t * b_pad, b_pad)
        xg_t = xg_sc[pl.ds(row, b_pad), :]           # precomputed x-gates + bias
        # Recurrent matmul only: K=128 (h half), bf16 operands, f32 accumulate.
        gates = xg_t + jnp.dot(h.astype(jnp.bfloat16), w_hh,
                               preferred_element_type=jnp.float32)
        # PyTorch gate order (i, f, g, o); each slice is a whole 128-lane span.
        i_g = jax.nn.sigmoid(gates[:, 0 * LANE:1 * LANE])
        f_g = jax.nn.sigmoid(gates[:, 1 * LANE:2 * LANE])
        g_g = jnp.tanh(gates[:, 2 * LANE:3 * LANE])
        o_g = jax.nn.sigmoid(gates[:, 3 * LANE:4 * LANE])
        c_new = f_g * c + i_g * g_g
        h_new = o_g * jnp.tanh(c_new)
        # Padded lanes (>= HIDDEN) stay exactly 0: preact 0 there -> sigmoid 0.5
        # / tanh 0 -> c stays 0, h stays 0; their weight rows/cols are 0.
        return h_new, c_new

    h_fin, c_fin = lax.fori_loop(0, t_tile, step, (h_sc[...], c_sc[...]),
                                 unroll=min(8, t_tile))
    h_sc[...] = h_fin
    c_sc[...] = c_fin

    @pl.when(tt == pl.num_programs(0) - 1)
    def _():
        # Final Linear(64, 10) on the last hidden state (kept f32; one matmul).
        out = (jnp.dot(h_fin, wout_ref[...], preferred_element_type=jnp.float32)
               + bout_ref[...])
        o_ref[...] = out.astype(o_ref.dtype)


def rnn_forward(x, w_ih, w_hh, b_ih, b_hh, w_out, b_out):
    """x: [B, T, INPUT_SIZE] float32 (batch_first, like the PyTorch module)."""
    B, T, I = x.shape
    assert I == INPUT_SIZE
    H = HIDDEN
    B_pad = max(8, ((B + 7) // 8) * 8)
    t_tile = _pick_t_tile(T)
    n_tiles = T // t_tile

    # x -> time-major, batch padded to 8 sublanes, input padded to 64 lanes,
    # flattened to a 2D [T*B_pad, 64] bf16 slab so the kernel needs no reshape.
    x_tbi = jnp.transpose(x, (1, 0, 2)).astype(jnp.bfloat16)
    x_pad = jnp.zeros((T, B_pad, X_LANES), jnp.bfloat16).at[:, :B, :I].set(x_tbi)
    x2d = x_pad.reshape(T * B_pad, X_LANES)

    # Weight layouts: gate g occupies lanes g*128 : g*128+H; everything else is
    # zero so padded gate lanes get a preactivation of exactly 0.
    w_ih_pad = jnp.zeros((X_LANES, G4), jnp.float32)
    w_hh_pad = jnp.zeros((LANE, G4), jnp.float32)
    b_f = jnp.zeros((1, G4), jnp.float32)
    b_sum = (b_ih + b_hh).astype(jnp.float32)
    for g in range(4):
        w_ih_pad = w_ih_pad.at[0:I, g * LANE:g * LANE + H].set(
            w_ih[g * H:(g + 1) * H, :].T)
        w_hh_pad = w_hh_pad.at[0:H, g * LANE:g * LANE + H].set(
            w_hh[g * H:(g + 1) * H, :].T)
        b_f = b_f.at[0, g * LANE:g * LANE + H].set(b_sum[g * H:(g + 1) * H])
    w_ih_pad = w_ih_pad.astype(jnp.bfloat16)   # MXU operands in bf16
    w_hh_pad = w_hh_pad.astype(jnp.bfloat16)

    # Output projection, padded to a full [128, 128] tile / 128-lane bias (f32).
    wout_pad = jnp.zeros((LANE, LANE), jnp.float32).at[:H, :OUT].set(w_out.T)
    bout_pad = jnp.zeros((1, LANE), jnp.float32).at[0, :OUT].set(b_out)

    kernel = functools.partial(lstm_last_kernel, t_tile=t_tile, b_pad=B_pad)

    out_pad = pl.pallas_call(
        kernel,
        out_shape=jax.ShapeDtypeStruct((B_pad, LANE), jnp.float32),
        grid_spec=pltpu.PrefetchScalarGridSpec(
            num_scalar_prefetch=0,
            grid=(n_tiles,),
            in_specs=[
                pl.BlockSpec((t_tile * B_pad, X_LANES), lambda tt: (tt, 0)),  # x
                pl.BlockSpec((X_LANES, G4), lambda tt: (0, 0)),   # W_ih (bf16)
                pl.BlockSpec((1, G4), lambda tt: (0, 0)),         # fused bias
                pl.BlockSpec((LANE, G4), lambda tt: (0, 0)),      # W_hh (bf16)
                pl.BlockSpec((LANE, LANE), lambda tt: (0, 0)),    # W_out (padded)
                pl.BlockSpec((1, LANE), lambda tt: (0, 0)),       # b_out (padded)
            ],
            out_specs=pl.BlockSpec((B_pad, LANE), lambda tt: (0, 0)),
            scratch_shapes=[
                pltpu.VMEM((t_tile * B_pad, G4), jnp.float32),  # x-gates + bias
                pltpu.VMEM((B_pad, LANE), jnp.float32),         # h carry
                pltpu.VMEM((B_pad, LANE), jnp.float32),         # c carry
            ],
        ),
        compiler_params=pltpu.CompilerParams(
            dimension_semantics=("arbitrary",)),   # serial recurrence over time
    )(x2d, w_ih_pad, b_f, w_hh_pad, wout_pad, bout_pad)

    # TODO(synk): on v7x, shard the padded batch across the 2 TensorCores with a
    # leading "parallel" batch-grid axis once B_pad >= 16.
    # TODO(synk): optional v6e/v7x win: pack gates into 4x64=256 output lanes so
    # the recurrent matmul is a single 256-wide MXU tile per step.
    return out_pad[:B, :OUT]


def rnn_forward_ref(x, w_ih, w_hh, b_ih, b_hh, w_out, b_out):
    """Pure-JAX reference matching torch.nn.LSTM (1 layer, batch_first)."""
    B, T, _ = x.shape
    h = jnp.zeros((B, HIDDEN), jnp.float32)
    c = jnp.zeros((B, HIDDEN), jnp.float32)
    for t in range(T):
        gates = x[:, t, :] @ w_ih.T + b_ih + h @ w_hh.T + b_hh
        i_g = jax.nn.sigmoid(gates[:, 0 * HIDDEN:1 * HIDDEN])
        f_g = jax.nn.sigmoid(gates[:, 1 * HIDDEN:2 * HIDDEN])
        g_g = jnp.tanh(gates[:, 2 * HIDDEN:3 * HIDDEN])
        o_g = jax.nn.sigmoid(gates[:, 3 * HIDDEN:4 * HIDDEN])
        c = f_g * c + i_g * g_g
        h = o_g * jnp.tanh(c)
    return h @ w_out.T + b_out


if __name__ == "__main__":
    key = jax.random.PRNGKey(0)
    ks = jax.random.split(key, 8)

    B, T = 2, 8
    bound = 1.0 / (HIDDEN ** 0.5)
    w_ih = jax.random.uniform(ks[0], (4 * HIDDEN, INPUT_SIZE), jnp.float32, -bound, bound)
    w_hh = jax.random.uniform(ks[1], (4 * HIDDEN, HIDDEN), jnp.float32, -bound, bound)
    b_ih = jax.random.uniform(ks[2], (4 * HIDDEN,), jnp.float32, -bound, bound)
    b_hh = jax.random.uniform(ks[3], (4 * HIDDEN,), jnp.float32, -bound, bound)
    w_out = jax.random.uniform(ks[4], (OUT, HIDDEN), jnp.float32, -bound, bound)
    b_out = jax.random.uniform(ks[5], (OUT,), jnp.float32, -bound, bound)

    x = jax.random.normal(ks[6], (B, T, INPUT_SIZE), jnp.float32)

    out = rnn_forward(x, w_ih, w_hh, b_ih, b_hh, w_out, b_out)
    out = jax.block_until_ready(out)

    ref = rnn_forward_ref(x, w_ih, w_hh, b_ih, b_hh, w_out, b_out)
    assert out.shape == (B, OUT)
    # bf16 MXU operands (f32 accumulation) -> relaxed tolerance vs pure-f32 ref.
    assert jnp.allclose(out, ref, atol=2e-2, rtol=2e-2), \
        f"max abs err {jnp.max(jnp.abs(out - ref))}"

    print("KERNEL_OK")
</pallas_src>

<mosaic_0001>
module attributes {stable_mosaic.version = 11 : i64} {
  func.func @lstm_last_kernel(%arg0: i32, %arg1: memref<64x64xbf16, #tpu.memory_space<vmem>>, %arg2: memref<64x512xbf16, #tpu.memory_space<vmem>>, %arg3: memref<1x512xf32, #tpu.memory_space<vmem>>, %arg4: memref<128x512xbf16, #tpu.memory_space<vmem>>, %arg5: memref<128x128xf32, #tpu.memory_space<vmem>>, %arg6: memref<1x128xf32, #tpu.memory_space<vmem>>, %arg7: memref<8x128xf32, #tpu.memory_space<vmem>>, %arg8: memref<64x512xf32, #tpu.memory_space<vmem>>, %arg9: memref<8x128xf32, #tpu.memory_space<vmem>>, %arg10: memref<8x128xf32, #tpu.memory_space<vmem>>) attributes {dimension_semantics = [#tpu.dimension_semantics<arbitrary>], iteration_bounds = array<i64: 1>, scalar_prefetch = 0 : i64, scratch_operands = 3 : i64, tpu.core_type = #tpu.core_type<tc>, window_params = [{transform_indices = @transform_0, window_bounds = array<i64: 64, 64>}, {pipeline_mode = #tpu.pipeline_mode<synchronous>, transform_indices = @transform_1, window_bounds = array<i64: 64, 512>}, {pipeline_mode = #tpu.pipeline_mode<synchronous>, transform_indices = @transform_2, window_bounds = array<i64: 1, 512>}, {pipeline_mode = #tpu.pipeline_mode<synchronous>, transform_indices = @transform_3, window_bounds = array<i64: 128, 512>}, {pipeline_mode = #tpu.pipeline_mode<synchronous>, transform_indices = @transform_4, window_bounds = array<i64: 128, 128>}, {pipeline_mode = #tpu.pipeline_mode<synchronous>, transform_indices = @transform_5, window_bounds = array<i64: 1, 128>}, {pipeline_mode = #tpu.pipeline_mode<synchronous>, transform_indices = @transform_6, window_bounds = array<i64: 8, 128>}]} {
    %c0_i32 = arith.constant 0 : i32
    %0 = arith.cmpi eq, %arg0, %c0_i32 : i32
    %1 = arith.extui %0 : i1 to i32
    %c0_i32_0 = arith.constant 0 : i32
    %2 = arith.cmpi ne, %1, %c0_i32_0 : i32
    scf.if %2 {
      %cst_69 = arith.constant 0.000000e+00 : f32
      %274 = vector.broadcast %cst_69 : f32 to vector<8x128xf32>
      %c0_70 = arith.constant 0 : index
      %c0_71 = arith.constant 0 : index
      %275 = vector.load %arg9[%c0_70, %c0_71] : memref<8x128xf32, #tpu.memory_space<vmem>>, vector<8x128xf32>
      tpu.vector_store %arg9[%c0_70, %c0_71], %274 {strides = array<i32>} : memref<8x128xf32, #tpu.memory_space<vmem>>, vector<8x128xf32>,
      %cst_72 = arith.constant 0.000000e+00 : f32
      %276 = vector.broadcast %cst_72 : f32 to vector<8x128xf32>
      %c0_73 = arith.constant 0 : index
      %c0_74 = arith.constant 0 : index
      %277 = vector.load %arg10[%c0_73, %c0_74] : memref<8x128xf32, #tpu.memory_space<vmem>>, vector<8x128xf32>
      tpu.vector_store %arg10[%c0_73, %c0_74], %276 {strides = array<i32>} : memref<8x128xf32, #tpu.memory_space<vmem>>, vector<8x128xf32>,
    } else {
    }
    %c0 = arith.constant 0 : index
    %c0_1 = arith.constant 0 : index
    %3 = vector.load %arg1[%c0, %c0_1] : memref<64x64xbf16, #tpu.memory_space<vmem>>, vector<64x64xbf16>
    %c0_2 = arith.constant 0 : index
    %c0_3 = arith.constant 0 : index
    %4 = vector.load %arg2[%c0_2, %c0_3] : memref<64x512xbf16, #tpu.memory_space<vmem>>, vector<64x512xbf16>
    %cst = arith.constant dense<0.000000e+00> : vector<64x512xf32>
    %5 = tpu.matmul %3, %4, %cst {dimension_numbers = #tpu.dot_dimension_numbers<[1], [0], [0], [1], [0, 0, 1, 1], [], []>} : vector<64x64xbf16>, vector<64x512xbf16>, vector<64x512xf32> -> vector<64x512xf32>
    %c0_4 = arith.constant 0 : index
    %c0_5 = arith.constant 0 : index
    %6 = vector.load %arg3[%c0_4, %c0_5] : memref<1x512xf32, #tpu.memory_space<vmem>>, vector<1x512xf32>
    %7 = vector.broadcast %6 : vector<1x512xf32> to vector<64x512xf32>
    %8 = arith.addf %5, %7 : vector<64x512xf32>
    %c0_6 = arith.constant 0 : index
    %c0_7 = arith.constant 0 : index
    %9 = vector.load %arg8[%c0_6, %c0_7] : memref<64x512xf32, #tpu.memory_space<vmem>>, vector<64x512xf32>
    tpu.vector_store %arg8[%c0_6, %c0_7], %8 {strides = array<i32>} : memref<64x512xf32, #tpu.memory_space<vmem>>, vector<64x512xf32>,
    %c0_8 = arith.constant 0 : index
    %c0_9 = arith.constant 0 : index
    %10 = vector.load %arg4[%c0_8, %c0_9] : memref<128x512xbf16, #tpu.memory_space<vmem>>, vector<128x512xbf16>
    %c0_10 = arith.constant 0 : index
    %c0_11 = arith.constant 0 : index
    %11 = vector.load %arg9[%c0_10, %c0_11] : memref<8x128xf32, #tpu.memory_space<vmem>>, vector<8x128xf32>
    %c0_12 = arith.constant 0 : index
    %c0_13 = arith.constant 0 : index
    %12 = vector.load %arg10[%c0_12, %c0_13] : memref<8x128xf32, #tpu.memory_space<vmem>>, vector<8x128xf32>
    %c0_i32_14 = arith.constant 0 : i32
    %c8_i32 = arith.constant 8 : i32
    %13 = arith.muli %c0_i32_14, %c8_i32 : i32
    %14 = tpu.assume_multiple %13, 8 : i32
    %15 = arith.index_cast %14 : i32 to index
    %c0_15 = arith.constant 0 : index
    %16 = vector.load %arg8[%15, %c0_15] : memref<64x512xf32, #tpu.memory_space<vmem>>, vector<8x512xf32>
    %17 = arith.truncf %11 : vector<8x128xf32> to vector<8x128xbf16>
    %cst_16 = arith.constant dense<0.000000e+00> : vector<8x512xf32>
    %18 = tpu.matmul %17, %10, %cst_16 {dimension_numbers = #tpu.dot_dimension_numbers<[1], [0], [0], [1], [0, 0, 1, 1], [], []>} : vector<8x128xbf16>, vector<128x512xbf16>, vector<8x512xf32> -> vector<8x512xf32>
    %19 = arith.addf %16, %18 : vector<8x512xf32>
    %20 = vector.extract_strided_slice %19 {offsets = [0, 0], sizes = [8, 128], strides = [1, 1]} : vector<8x512xf32> to vector<8x128xf32>
    %21 = arith.negf %20 : vector<8x128xf32>
    %22 = math.exp %21 : vector<8x128xf32>
    %cst_17 = arith.constant 1.000000e+00 : f32
    %23 = vector.broadcast %cst_17 : f32 to vector<8x128xf32>
    %24 = arith.addf %23, %22 : vector<8x128xf32>
    %25 = arith.divf %23, %24 : vector<8x128xf32>
    %26 = vector.extract_strided_slice %19 {offsets = [0, 128], sizes = [8, 128], strides = [1, 1]} : vector<8x512xf32> to vector<8x128xf32>
    %27 = arith.negf %26 : vector<8x128xf32>
    %28 = math.exp %27 : vector<8x128xf32>
    %cst_18 = arith.constant 1.000000e+00 : f32
    %29 = vector.broadcast %cst_18 : f32 to vector<8x128xf32>
    %30 = arith.addf %29, %28 : vector<8x128xf32>
    %31 = arith.divf %29, %30 : vector<8x128xf32>
    %32 = vector.extract_strided_slice %19 {offsets = [0, 256], sizes = [8, 128], strides = [1, 1]} : vector<8x512xf32> to vector<8x128xf32>
    %33 = math.tanh %32 : vector<8x128xf32>
    %34 = vector.extract_strided_slice %19 {offsets = [0, 384], sizes = [8, 128], strides = [1, 1]} : vector<8x512xf32> to vector<8x128xf32>
    %35 = arith.negf %34 : vector<8x128xf32>
    %36 = math.exp %35 : vector<8x128xf32>
    %cst_19 = arith.constant 1.000000e+00 : f32
    %37 = vector.broadcast %cst_19 : f32 to vector<8x128xf32>
    %38 = arith.addf %37, %36 : vector<8x128xf32>
    %39 = arith.divf %37, %38 : vector<8x128xf32>
    %40 = arith.mulf %31, %12 : vector<8x128xf32>
    %41 = arith.mulf %25, %33 : vector<8x128xf32>
    %42 = arith.addf %40, %41 : vector<8x128xf32>
    %43 = math.tanh %42 : vector<8x128xf32>
    %44 = arith.mulf %39, %43 : vector<8x128xf32>
    %c1_i32 = arith.constant 1 : i32
    %c8_i32_20 = arith.constant 8 : i32
    %45 = arith.muli %c1_i32, %c8_i32_20 : i32
    %46 = tpu.assume_multiple %45, 8 : i32
    %47 = arith.index_cast %46 : i32 to index
    %c0_21 = arith.constant 0 : index
    %48 = vector.load %arg8[%47, %c0_21] : memref<64x512xf32, #tpu.memory_space<vmem>>, vector<8x512xf32>
    %49 = arith.truncf %44 : vector<8x128xf32> to vector<8x128xbf16>
    %cst_22 = arith.constant dense<0.000000e+00> : vector<8x512xf32>
    %50 = tpu.matmul %49, %10, %cst_22 {dimension_numbers = #tpu.dot_dimension_numbers<[1], [0], [0], [1], [0, 0, 1, 1], [], []>} : vector<8x128xbf16>, vector<128x512xbf16>, vector<8x512xf32> -> vector<8x512xf32>
    %51 = arith.addf %48, %50 : vector<8x512xf32>
    %52 = vector.extract_strided_slice %51 {offsets = [0, 0], sizes = [8, 128], strides = [1, 1]} : vector<8x512xf32> to vector<8x128xf32>
    %53 = arith.negf %52 : vector<8x128xf32>
    %54 = math.exp %53 : vector<8x128xf32>
    %cst_23 = arith.constant 1.000000e+00 : f32
    %55 = vector.broadcast %cst_23 : f32 to vector<8x128xf32>
    %56 = arith.addf %55, %54 : vector<8x128xf32>
    %57 = arith.divf %55, %56 : vector<8x128xf32>
    %58 = vector.extract_strided_slice %51 {offsets = [0, 128], sizes = [8, 128], strides = [1, 1]} : vector<8x512xf32> to vector<8x128xf32>
    %59 = arith.negf %58 : vector<8x128xf32>
    %60 = math.exp %59 : vector<8x128xf32>
    %cst_24 = arith.constant 1.000000e+00 : f32
    %61 = vector.broadcast %cst_24 : f32 to vector<8x128xf32>
    %62 = arith.addf %61, %60 : vector<8x128xf32>
    %63 = arith.divf %61, %62 : vector<8x128xf32>
    %64 = vector.extract_strided_slice %51 {offsets = [0, 256], sizes = [8, 128], strides = [1, 1]} : vector<8x512xf32> to vector<8x128xf32>
    %65 = math.tanh %64 : vector<8x128xf32>
    %66 = vector.extract_strided_slice %51 {offsets = [0, 384], sizes = [8, 128], strides = [1, 1]} : vector<8x512xf32> to vector<8x128xf32>
    %67 = arith.negf %66 : vector<8x128xf32>
    %68 = math.exp %67 : vector<8x128xf32>
    %cst_25 = arith.constant 1.000000e+00 : f32
    %69 = vector.broadcast %cst_25 : f32 to vector<8x128xf32>
    %70 = arith.addf %69, %68 : vector<8x128xf32>
    %71 = arith.divf %69, %70 : vector<8x128xf32>
    %72 = arith.mulf %63, %42 : vector<8x128xf32>
    %73 = arith.mulf %57, %65 : vector<8x128xf32>
    %74 = arith.addf %72, %73 : vector<8x128xf32>
    %75 = math.tanh %74 : vector<8x128xf32>
    %76 = arith.mulf %71, %75 : vector<8x128xf32>
    %c2_i32 = arith.constant 2 : i32
    %c8_i32_26 = arith.constant 8 : i32
    %77 = arith.muli %c2_i32, %c8_i32_26 : i32
    %78 = tpu.assume_multiple %77, 8 : i32
    %79 = arith.index_cast %78 : i32 to index
    %c0_27 = arith.constant 0 : index
    %80 = vector.load %arg8[%79, %c0_27] : memref<64x512xf32, #tpu.memory_space<vmem>>, vector<8x512xf32>
    %81 = arith.truncf %76 : vector<8x128xf32> to vector<8x128xbf16>
    %cst_28 = arith.constant dense<0.000000e+00> : vector<8x512xf32>
    %82 = tpu.matmul %81, %10, %cst_28 {dimension_numbers = #tpu.dot_dimension_numbers<[1], [0], [0], [1], [0, 0, 1, 1], [], []>} : vector<8x128xbf16>, vector<128x512xbf16>, vector<8x512xf32> -> vector<8x512xf32>
    %83 = arith.addf %80, %82 : vector<8x512xf32>
    %84 = vector.extract_strided_slice %83 {offsets = [0, 0], sizes = [8, 128], strides = [1, 1]} : vector<8x512xf32> to vector<8x128xf32>
    %85 = arith.negf %84 : vector<8x128xf32>
    %86 = math.exp %85 : vector<8x128xf32>
    %cst_29 = arith.constant 1.000000e+00 : f32
    %87 = vector.broadcast %cst_29 : f32 to vector<8x128xf32>
    %88 = arith.addf %87, %86 : vector<8x128xf32>
    %89 = arith.divf %87, %88 : vector<8x128xf32>
    %90 = vector.extract_strided_slice %83 {offsets = [0, 128], sizes = [8, 128], strides = [1, 1]} : vector<8x512xf32> to vector<8x128xf32>
    %91 = arith.negf %90 : vector<8x128xf32>
    %92 = math.exp %91 : vector<8x128xf32>
    %cst_30 = arith.constant 1.000000e+00 : f32
    %93 = vector.broadcast %cst_30 : f32 to vector<8x128xf32>
    %94 = arith.addf %93, %92 : vector<8x128xf32>
    %95 = arith.divf %93, %94 : vector<8x128xf32>
    %96 = vector.extract_strided_slice %83 {offsets = [0, 256], sizes = [8, 128], strides = [1, 1]} : vector<8x512xf32> to vector<8x128xf32>
    %97 = math.tanh %96 : vector<8x128xf32>
    %98 = vector.extract_strided_slice %83 {offsets = [0, 384], sizes = [8, 128], strides = [1, 1]} : vector<8x512xf32> to vector<8x128xf32>
    %99 = arith.negf %98 : vector<8x128xf32>
    %100 = math.exp %99 : vector<8x128xf32>
    %cst_31 = arith.constant 1.000000e+00 : f32
    %101 = vector.broadcast %cst_31 : f32 to vector<8x128xf32>
    %102 = arith.addf %101, %100 : vector<8x128xf32>
    %103 = arith.divf %101, %102 : vector<8x128xf32>
    %104 = arith.mulf %95, %74 : vector<8x128xf32>
    %105 = arith.mulf %89, %97 : vector<8x128xf32>
    %106 = arith.addf %104, %105 : vector<8x128xf32>
    %107 = math.tanh %106 : vector<8x128xf32>
    %108 = arith.mulf %103, %107 : vector<8x128xf32>
    %c3_i32 = arith.constant 3 : i32
    %c8_i32_32 = arith.constant 8 : i32
    %109 = arith.muli %c3_i32, %c8_i32_32 : i32
    %110 = tpu.assume_multiple %109, 8 : i32
    %111 = arith.index_cast %110 : i32 to index
    %c0_33 = arith.constant 0 : index
    %112 = vector.load %arg8[%111, %c0_33] : memref<64x512xf32, #tpu.memory_space<vmem>>, vector<8x512xf32>
    %113 = arith.truncf %108 : vector<8x128xf32> to vector<8x128xbf16>
    %cst_34 = arith.constant dense<0.000000e+00> : vector<8x512xf32>
    %114 = tpu.matmul %113, %10, %cst_34 {dimension_numbers = #tpu.dot_dimension_numbers<[1], [0], [0], [1], [0, 0, 1, 1], [], []>} : vector<8x128xbf16>, vector<128x512xbf16>, vector<8x512xf32> -> vector<8x512xf32>
    %115 = arith.addf %112, %114 : vector<8x512xf32>
    %116 = vector.extract_strided_slice %115 {offsets = [0, 0], sizes = [8, 128], strides = [1, 1]} : vector<8x512xf32> to vector<8x128xf32>
    %117 = arith.negf %116 : vector<8x128xf32>
    %118 = math.exp %117 : vector<8x128xf32>
    %cst_35 = arith.constant 1.000000e+00 : f32
    %119 = vector.broadcast %cst_35 : f32 to vector<8x128xf32>
    %120 = arith.addf %119, %118 : vector<8x128xf32>
    %121 = arith.divf %119, %120 : vector<8x128xf32>
    %122 = vector.extract_strided_slice %115 {offsets = [0, 128], sizes = [8, 128], strides = [1, 1]} : vector<8x512xf32> to vector<8x128xf32>
    %123 = arith.negf %122 : vector<8x128xf32>
    %124 = math.exp %123 : vector<8x128xf32>
    %cst_36 = arith.constant 1.000000e+00 : f32
    %125 = vector.broadcast %cst_36 : f32 to vector<8x128xf32>
    %126 = arith.addf %125, %124 : vector<8x128xf32>
    %127 = arith.divf %125, %126 : vector<8x128xf32>
    %128 = vector.extract_strided_slice %115 {offsets = [0, 256], sizes = [8, 128], strides = [1, 1]} : vector<8x512xf32> to vector<8x128xf32>
    %129 = math.tanh %128 : vector<8x128xf32>
    %130 = vector.extract_strided_slice %115 {offsets = [0, 384], sizes = [8, 128], strides = [1, 1]} : vector<8x512xf32> to vector<8x128xf32>
    %131 = arith.negf %130 : vector<8x128xf32>
    %132 = math.exp %131 : vector<8x128xf32>
    %cst_37 = arith.constant 1.000000e+00 : f32
    %133 = vector.broadcast %cst_37 : f32 to vector<8x128xf32>
    %134 = arith.addf %133, %132 : vector<8x128xf32>
    %135 = arith.divf %133, %134 : vector<8x128xf32>
    %136 = arith.mulf %127, %106 : vector<8x128xf32>
    %137 = arith.mulf %121, %129 : vector<8x128xf32>
    %138 = arith.addf %136, %137 : vector<8x128xf32>
    %139 = math.tanh %138 : vector<8x128xf32>
    %140 = arith.mulf %135, %139 : vector<8x128xf32>
    %c4_i32 = arith.constant 4 : i32
    %c8_i32_38 = arith.constant 8 : i32
    %141 = arith.muli %c4_i32, %c8_i32_38 : i32
    %142 = tpu.assume_multiple %141, 8 : i32
    %143 = arith.index_cast %142 : i32 to index
    %c0_39 = arith.constant 0 : index
    %144 = vector.load %arg8[%143, %c0_39] : memref<64x512xf32, #tpu.memory_space<vmem>>, vector<8x512xf32>
    %145 = arith.truncf %140 : vector<8x128xf32> to vector<8x128xbf16>
    %cst_40 = arith.constant dense<0.000000e+00> : vector<8x512xf32>
    %146 = tpu.matmul %145, %10, %cst_40 {dimension_numbers = #tpu.dot_dimension_numbers<[1], [0], [0], [1], [0, 0, 1, 1], [], []>} : vector<8x128xbf16>, vector<128x512xbf16>, vector<8x512xf32> -> vector<8x512xf32>
    %147 = arith.addf %144, %146 : vector<8x512xf32>
    %148 = vector.extract_strided_slice %147 {offsets = [0, 0], sizes = [8, 128], strides = [1, 1]} : vector<8x512xf32> to vector<8x128xf32>
    %149 = arith.negf %148 : vector<8x128xf32>
    %150 = math.exp %149 : vector<8x128xf32>
    %cst_41 = arith.constant 1.000000e+00 : f32
    %151 = vector.broadcast %cst_41 : f32 to vector<8x128xf32>
    %152 = arith.addf %151, %150 : vector<8x128xf32>
    %153 = arith.divf %151, %152 : vector<8x128xf32>
    %154 = vector.extract_strided_slice %147 {offsets = [0, 128], sizes = [8, 128], strides = [1, 1]} : vector<8x512xf32> to vector<8x128xf32>
    %155 = arith.negf %154 : vector<8x128xf32>
    %156 = math.exp %155 : vector<8x128xf32>
    %cst_42 = arith.constant 1.000000e+00 : f32
    %157 = vector.broadcast %cst_42 : f32 to vector<8x128xf32>
    %158 = arith.addf %157, %156 : vector<8x128xf32>
    %159 = arith.divf %157, %158 : vector<8x128xf32>
    %160 = vector.extract_strided_slice %147 {offsets = [0, 256], sizes = [8, 128], strides = [1, 1]} : vector<8x512xf32> to vector<8x128xf32>
    %161 = math.tanh %160 : vector<8x128xf32>
    %162 = vector.extract_strided_slice %147 {offsets = [0, 384], sizes = [8, 128], strides = [1, 1]} : vector<8x512xf32> to vector<8x128xf32>
    %163 = arith.negf %162 : vector<8x128xf32>
    %164 = math.exp %163 : vector<8x128xf32>
    %cst_43 = arith.constant 1.000000e+00 : f32
    %165 = vector.broadcast %cst_43 : f32 to vector<8x128xf32>
    %166 = arith.addf %165, %164 : vector<8x128xf32>
    %167 = arith.divf %165, %166 : vector<8x128xf32>
    %168 = arith.mulf %159, %138 : vector<8x128xf32>
    %169 = arith.mulf %153, %161 : vector<8x128xf32>
    %170 = arith.addf %168, %169 : vector<8x128xf32>
    %171 = math.tanh %170 : vector<8x128xf32>
    %172 = arith.mulf %167, %171 : vector<8x128xf32>
    %c5_i32 = arith.constant 5 : i32
    %c8_i32_44 = arith.constant 8 : i32
    %173 = arith.muli %c5_i32, %c8_i32_44 : i32
    %174 = tpu.assume_multiple %173, 8 : i32
    %175 = arith.index_cast %174 : i32 to index
    %c0_45 = arith.constant 0 : index
    %176 = vector.load %arg8[%175, %c0_45] : memref<64x512xf32, #tpu.memory_space<vmem>>, vector<8x512xf32>
    %177 = arith.truncf %172 : vector<8x128xf32> to vector<8x128xbf16>
    %cst_46 = arith.constant dense<0.000000e+00> : vector<8x512xf32>
    %178 = tpu.matmul %177, %10, %cst_46 {dimension_numbers = #tpu.dot_dimension_numbers<[1], [0], [0], [1], [0, 0, 1, 1], [], []>} : vector<8x128xbf16>, vector<128x512xbf16>, vector<8x512xf32> -> vector<8x512xf32>
    %179 = arith.addf %176, %178 : vector<8x512xf32>
    %180 = vector.extract_strided_slice %179 {offsets = [0, 0], sizes = [8, 128], strides = [1, 1]} : vector<8x512xf32> to vector<8x128xf32>
    %181 = arith.negf %180 : vector<8x128xf32>
    %182 = math.exp %181 : vector<8x128xf32>
    %cst_47 = arith.constant 1.000000e+00 : f32
    %183 = vector.broadcast %cst_47 : f32 to vector<8x128xf32>
    %184 = arith.addf %183, %182 : vector<8x128xf32>
    %185 = arith.divf %183, %184 : vector<8x128xf32>
    %186 = vector.extract_strided_slice %179 {offsets = [0, 128], sizes = [8, 128], strides = [1, 1]} : vector<8x512xf32> to vector<8x128xf32>
    %187 = arith.negf %186 : vector<8x128xf32>
    %188 = math.exp %187 : vector<8x128xf32>
    %cst_48 = arith.constant 1.000000e+00 : f32
    %189 = vector.broadcast %cst_48 : f32 to vector<8x128xf32>
    %190 = arith.addf %189, %188 : vector<8x128xf32>
    %191 = arith.divf %189, %190 : vector<8x128xf32>
    %192 = vector.extract_strided_slice %179 {offsets = [0, 256], sizes = [8, 128], strides = [1, 1]} : vector<8x512xf32> to vector<8x128xf32>
    %193 = math.tanh %192 : vector<8x128xf32>
    %194 = vector.extract_strided_slice %179 {offsets = [0, 384], sizes = [8, 128], strides = [1, 1]} : vector<8x512xf32> to vector<8x128xf32>
    %195 = arith.negf %194 : vector<8x128xf32>
    %196 = math.exp %195 : vector<8x128xf32>
    %cst_49 = arith.constant 1.000000e+00 : f32
    %197 = vector.broadcast %cst_49 : f32 to vector<8x128xf32>
    %198 = arith.addf %197, %196 : vector<8x128xf32>
    %199 = arith.divf %197, %198 : vector<8x128xf32>
    %200 = arith.mulf %191, %170 : vector<8x128xf32>
    %201 = arith.mulf %185, %193 : vector<8x128xf32>
    %202 = arith.addf %200, %201 : vector<8x128xf32>
    %203 = math.tanh %202 : vector<8x128xf32>
    %204 = arith.mulf %199, %203 : vector<8x128xf32>
    %c6_i32 = arith.constant 6 : i32
    %c8_i32_50 = arith.constant 8 : i32
    %205 = arith.muli %c6_i32, %c8_i32_50 : i32
    %206 = tpu.assume_multiple %205, 8 : i32
    %207 = arith.index_cast %206 : i32 to index
    %c0_51 = arith.constant 0 : index
    %208 = vector.load %arg8[%207, %c0_51] : memref<64x512xf32, #tpu.memory_space<vmem>>, vector<8x512xf32>
    %209 = arith.truncf %204 : vector<8x128xf32> to vector<8x128xbf16>
    %cst_52 = arith.constant dense<0.000000e+00> : vector<8x512xf32>
    %210 = tpu.matmul %209, %10, %cst_52 {dimension_numbers = #tpu.dot_dimension_numbers<[1], [0], [0], [1], [0, 0, 1, 1], [], []>} : vector<8x128xbf16>, vector<128x512xbf16>, vector<8x512xf32> -> vector<8x512xf32>
    %211 = arith.addf %208, %210 : vector<8x512xf32>
    %212 = vector.extract_strided_slice %211 {offsets = [0, 0], sizes = [8, 128], strides = [1, 1]} : vector<8x512xf32> to vector<8x128xf32>
    %213 = arith.negf %212 : vector<8x128xf32>
    %214 = math.exp %213 : vector<8x128xf32>
    %cst_53 = arith.constant 1.000000e+00 : f32
    %215 = vector.broadcast %cst_53 : f32 to vector<8x128xf32>
    %216 = arith.addf %215, %214 : vector<8x128xf32>
    %217 = arith.divf %215, %216 : vector<8x128xf32>
    %218 = vector.extract_strided_slice %211 {offsets = [0, 128], sizes = [8, 128], strides = [1, 1]} : vector<8x512xf32> to vector<8x128xf32>
    %219 = arith.negf %218 : vector<8x128xf32>
    %220 = math.exp %219 : vector<8x128xf32>
    %cst_54 = arith.constant 1.000000e+00 : f32
    %221 = vector.broadcast %cst_54 : f32 to vector<8x128xf32>
    %222 = arith.addf %221, %220 : vector<8x128xf32>
    %223 = arith.divf %221, %222 : vector<8x128xf32>
    %224 = vector.extract_strided_slice %211 {offsets = [0, 256], sizes = [8, 128], strides = [1, 1]} : vector<8x512xf32> to vector<8x128xf32>
    %225 = math.tanh %224 : vector<8x128xf32>
    %226 = vector.extract_strided_slice %211 {offsets = [0, 384], sizes = [8, 128], strides = [1, 1]} : vector<8x512xf32> to vector<8x128xf32>
    %227 = arith.negf %226 : vector<8x128xf32>
    %228 = math.exp %227 : vector<8x128xf32>
    %cst_55 = arith.constant 1.000000e+00 : f32
    %229 = vector.broadcast %cst_55 : f32 to vector<8x128xf32>
    %230 = arith.addf %229, %228 : vector<8x128xf32>
    %231 = arith.divf %229, %230 : vector<8x128xf32>
    %232 = arith.mulf %223, %202 : vector<8x128xf32>
    %233 = arith.mulf %217, %225 : vector<8x128xf32>
    %234 = arith.addf %232, %233 : vector<8x128xf32>
    %235 = math.tanh %234 : vector<8x128xf32>
    %236 = arith.mulf %231, %235 : vector<8x128xf32>
    %c7_i32 = arith.constant 7 : i32
    %c8_i32_56 = arith.constant 8 : i32
    %237 = arith.muli %c7_i32, %c8_i32_56 : i32
    %238 = tpu.assume_multiple %237, 8 : i32
    %239 = arith.index_cast %238 : i32 to index
    %c0_57 = arith.constant 0 : index
    %240 = vector.load %arg8[%239, %c0_57] : memref<64x512xf32, #tpu.memory_space<vmem>>, vector<8x512xf32>
    %241 = arith.truncf %236 : vector<8x128xf32> to vector<8x128xbf16>
    %cst_58 = arith.constant dense<0.000000e+00> : vector<8x512xf32>
    %242 = tpu.matmul %241, %10, %cst_58 {dimension_numbers = #tpu.dot_dimension_numbers<[1], [0], [0], [1], [0, 0, 1, 1], [], []>} : vector<8x128xbf16>, vector<128x512xbf16>, vector<8x512xf32> -> vector<8x512xf32>
    %243 = arith.addf %240, %242 : vector<8x512xf32>
    %244 = vector.extract_strided_slice %243 {offsets = [0, 0], sizes = [8, 128], strides = [1, 1]} : vector<8x512xf32> to vector<8x128xf32>
    %245 = arith.negf %244 : vector<8x128xf32>
    %246 = math.exp %245 : vector<8x128xf32>
    %cst_59 = arith.constant 1.000000e+00 : f32
    %247 = vector.broadcast %cst_59 : f32 to vector<8x128xf32>
    %248 = arith.addf %247, %246 : vector<8x128xf32>
    %249 = arith.divf %247, %248 : vector<8x128xf32>
    %250 = vector.extract_strided_slice %243 {offsets = [0, 128], sizes = [8, 128], strides = [1, 1]} : vector<8x512xf32> to vector<8x128xf32>
    %251 = arith.negf %250 : vector<8x128xf32>
    %252 = math.exp %251 : vector<8x128xf32>
    %cst_60 = arith.constant 1.000000e+00 : f32
    %253 = vector.broadcast %cst_60 : f32 to vector<8x128xf32>
    %254 = arith.addf %253, %252 : vector<8x128xf32>
    %255 = arith.divf %253, %254 : vector<8x128xf32>
    %256 = vector.extract_strided_slice %243 {offsets = [0, 256], sizes = [8, 128], strides = [1, 1]} : vector<8x512xf32> to vector<8x128xf32>
    %257 = math.tanh %256 : vector<8x128xf32>
    %258 = vector.extract_strided_slice %243 {offsets = [0, 384], sizes = [8, 128], strides = [1, 1]} : vector<8x512xf32> to vector<8x128xf32>
    %259 = arith.negf %258 : vector<8x128xf32>
    %260 = math.exp %259 : vector<8x128xf32>
    %cst_61 = arith.constant 1.000000e+00 : f32
    %261 = vector.broadcast %cst_61 : f32 to vector<8x128xf32>
    %262 = arith.addf %261, %260 : vector<8x128xf32>
    %263 = arith.divf %261, %262 : vector<8x128xf32>
    %264 = arith.mulf %255, %234 : vector<8x128xf32>
    %265 = arith.mulf %249, %257 : vector<8x128xf32>
    %266 = arith.addf %264, %265 : vector<8x128xf32>
    %267 = math.tanh %266 : vector<8x128xf32>
    %268 = arith.mulf %263, %267 : vector<8x128xf32>
    %c8_i32_62 = arith.constant 8 : i32
    %c0_63 = arith.constant 0 : index
    %c0_64 = arith.constant 0 : index
    %269 = vector.load %arg9[%c0_63, %c0_64] : memref<8x128xf32, #tpu.memory_space<vmem>>, vector<8x128xf32>
    tpu.vector_store %arg9[%c0_63, %c0_64], %268 {strides = array<i32>} : memref<8x128xf32, #tpu.memory_space<vmem>>, vector<8x128xf32>,
    %c0_65 = arith.constant 0 : index
    %c0_66 = arith.constant 0 : index
    %270 = vector.load %arg10[%c0_65, %c0_66] : memref<8x128xf32, #tpu.memory_space<vmem>>, vector<8x128xf32>
    tpu.vector_store %arg10[%c0_65, %c0_66], %266 {strides = array<i32>} : memref<8x128xf32, #tpu.memory_space<vmem>>, vector<8x128xf32>,
    %c0_i32_67 = arith.constant 0 : i32
    %271 = arith.cmpi eq, %arg0, %c0_i32_67 : i32
    %272 = arith.extui %271 : i1 to i32
    %c0_i32_68 = arith.constant 0 : i32
    %273 = arith.cmpi ne, %272, %c0_i32_68 : i32
    scf.if %273 {
      %c0_69 = arith.constant 0 : index
      %c0_70 = arith.constant 0 : index
      %274 = vector.load %arg5[%c0_69, %c0_70] : memref<128x128xf32, #tpu.memory_space<vmem>>, vector<128x128xf32>
      %cst_71 = arith.constant dense<0.000000e+00> : vector<8x128xf32>
      %275 = tpu.matmul %268, %274, %cst_71 {dimension_numbers = #tpu.dot_dimension_numbers<[1], [0], [0], [1], [0, 0, 1, 1], [], []>} : vector<8x128xf32>, vector<128x128xf32>, vector<8x128xf32> -> vector<8x128xf32>
      %c0_72 = arith.constant 0 : index
      %c0_73 = arith.constant 0 : index
      %276 = vector.load %arg6[%c0_72, %c0_73] : memref<1x128xf32, #tpu.memory_space<vmem>>, vector<1x128xf32>
      %277 = vector.broadcast %276 : vector<1x128xf32> to vector<8x128xf32>
      %278 = arith.addf %275, %277 : vector<8x128xf32>
      %c0_74 = arith.constant 0 : index
      %c0_75 = arith.constant 0 : index
      %279 = vector.load %arg7[%c0_74, %c0_75] : memref<8x128xf32, #tpu.memory_space<vmem>>, vector<8x128xf32>
      tpu.vector_store %arg7[%c0_74, %c0_75], %278 {strides = array<i32>} : memref<8x128xf32, #tpu.memory_space<vmem>>, vector<8x128xf32>,
    } else {
    }
    return
  }
  func.func @transform_0(%arg0: i32) -> (i32, i32) {
    %c0_i32 = arith.constant 0 : i32
    %c0_i32_0 = arith.constant 0 : i32
    return %arg0, %c0_i32 : i32, i32
  }
  func.func @transform_1(%arg0: i32) -> (i32, i32) {
    %c0_i32 = arith.constant 0 : i32
    %c0_i32_0 = arith.constant 0 : i32
    %c0_i32_1 = arith.constant 0 : i32
    return %c0_i32, %c0_i32_0 : i32, i32
  }
  func.func @transform_2(%arg0: i32) -> (i32, i32) {
    %c0_i32 = arith.constant 0 : i32
    %c0_i32_0 = arith.constant 0 : i32
    %c0_i32_1 = arith.constant 0 : i32
    return %c0_i32, %c0_i32_0 : i32, i32
  }
  func.func @transform_3(%arg0: i32) -> (i32, i32) {
    %c0_i32 = arith.constant 0 : i32
    %c0_i32_0 = arith.constant 0 : i32
    %c0_i32_1 = arith.constant 0 : i32
    return %c0_i32, %c0_i32_0 : i32, i32
  }
  func.func @transform_4(%arg0: i32) -> (i32, i32) {
    %c0_i32 = arith.constant 0 : i32
    %c0_i32_0 = arith.constant 0 : i32
    %c0_i32_1 = arith.constant 0 : i32
    return %c0_i32, %c0_i32_0 : i32, i32
  }
  func.func @transform_5(%arg0: i32) -> (i32, i32) {
    %c0_i32 = arith.constant 0 : i32
    %c0_i32_0 = arith.constant 0 : i32
    %c0_i32_1 = arith.constant 0 : i32
    return %c0_i32, %c0_i32_0 : i32, i32
  }
  func.func @transform_6(%arg0: i32) -> (i32, i32) {
    %c0_i32 = arith.constant 0 : i32
    %c0_i32_0 = arith.constant 0 : i32
    %c0_i32_1 = arith.constant 0 : i32
    return %c0_i32, %c0_i32_0 : i32, i32
  }
}

</mosaic_0001>

<bundles_post_ra>
// kernel: tpu_custom_call.1
= control target key start
LH: loop header
LB: loop body
LE: loop exit
PB: predicated region body
PF: predicated region fallthrough
CT: control target
= control target key end

     0   :  { %11 = vsyncpa [#allocation6], 0  ;;  %s2814_s0 = inlined_call_operand.hbm [shape: bf16[64,64], index: 0, kind: input, shape index: {}]   ;;  %s2815_s1 = inlined_call_operand.hbm [shape: bf16[64,512], index: 1, kind: input, shape index: {}]   ;;  %s2816_s2 = inlined_call_operand.hbm [shape: f32[1,512], index: 2, kind: input, shape index: {}]   ;;  %s2817_s3 = inlined_call_operand.hbm [shape: bf16[128,512], index: 3, kind: input, shape index: {}]   ;;  %s2818_s4 = inlined_call_operand.hbm [shape: f32[128,128], index: 4, kind: input, shape index: {}]   ;;  %s2819_s5 = inlined_call_operand.vmem [shape: f32[1,128], index: 5, kind: input, shape index: {}]   ;;  %s2820_s6 = inlined_call_operand.hbm [shape: f32[8,128], index: 6, kind: output, shape index: {}]  }
   0x1   :  { %12 = vsyncpa [#allocation9], 0 }
   0x2   :  { %13 = vsyncpa [#allocation12], 0 }
   0x3   :  { %14 = vsyncpa [#allocation7], 0  ;;  %s2212_s21 = smov [#allocation8]  }
   0x4   :  { %s32_s22 = sshll.u32 %s2212_s21, 4  ;;  %s33_s22 = int_to_ptr.vmem [resolvable:$true] %s32_s22 }
   0x5   :  { %s2092_s23 = scalar_lea.vmem %s33_s22, 2048  ;;  %p2097_p1 = scmp.lt.s32.totalorder %s33_s22, %s33_s22 }
   0x6   :  { %p2093_p0 = scmp.ne.s32.totalorder %s33_s22, %s2092_s23  ;;  %p2098_p2 = scmp.lt.s32.totalorder %s2092_s23, %s2092_s23 }
   0x8   :  { %p2099_p3 = por %p2098_p2, %p2097_p1 }
   0xa   :  { %p2100_p4 = pnand %p2099_p3, %p2093_p0 }
   0xc   :  { %2103 = shalt.err (!%p2100_p4)
}
   0xd   :  { %s2213_s24 = smov 256   ;;  %s2214_s25 = smov 16  }
   0xe   :  { %38 = dma.hbm_to_vmem [thread:$0]  %s2815_s1, 2048, %s33_s22, [#allocation9], %s2213_s24, %s2213_s24, %s2214_s25  }
   0xf   :  { %s2215_s28 = smov [#allocation11]   ;;  %s2216_s30 = smov [#allocation5]  }
  0x10   :  { %s54_s29 = sshll.u32 %s2215_s28, 4  ;;  %s20_s7 = sshll.u32 %s2216_s30, 4  ;;  %s55_s29 = int_to_ptr.vmem [resolvable:$true] %s54_s29  ;;  %s21_s7 = int_to_ptr.vmem [resolvable:$true] %s20_s7 }
  0x11   :  { %s2112_s8 = scalar_lea.vmem %s55_s29, 4096  ;;  %p2117_p6 = scmp.lt.s32.totalorder %s55_s29, %s55_s29 }
  0x12   :  { %p2113_p5 = scmp.ne.s32.totalorder %s55_s29, %s2112_s8  ;;  %p2118_p7 = scmp.lt.s32.totalorder %s2112_s8, %s2112_s8 }
  0x14   :  { %p2119_p8 = por %p2118_p7, %p2117_p6 }
  0x16   :  { %p2120_p9 = pnand %p2119_p8, %p2113_p5 }
  0x18   :  { %2123 = shalt.err (!%p2120_p9)
}
  0x19   :  { %60 = dma.hbm_to_vmem [thread:$0]  %s2817_s3, 4096, %s55_s29, [#allocation12], %s2213_s24, %s2213_s24, %s2214_s25  }
  0x1a   :  { %s2132_s11 = scalar_lea.vmem %s21_s7, 512  ;;  %p2137_p11 = scmp.lt.s32.totalorder %s21_s7, %s21_s7 }
  0x1b   :  { %p2133_p10 = scmp.ne.s32.totalorder %s21_s7, %s2132_s11  ;;  %p2138_p12 = scmp.lt.s32.totalorder %s2132_s11, %s2132_s11 }
  0x1d   :  { %p2139_p13 = por %p2138_p12, %p2137_p11 }
  0x1f   :  { %p2140_p0 = pnand %p2139_p13, %p2133_p10 }
  0x21   :  { %2143 = shalt.err (!%p2140_p0)
}
  0x22   :  { %s2217_s1 = smov 64   ;;  %s2218_s12 = smov 4  }
  0x23   :  { %26 = dma.hbm_to_vmem [thread:$0]  %s2814_s0, 512, %s21_s7, [#allocation6], %s2217_s1, %s2217_s1, %s2218_s12  }
  0x24   :  { %s2219_s15 = smov [#allocation10]   ;;  %s2220_s17 = smov [#allocation13]  }
  0x25   :  { %s45_s16 = sshll.u32 %s2219_s15, 4  ;;  %s66_s18 = sshll.u32 %s2220_s17, 4  ;;  %s46_s16 = int_to_ptr.vmem [resolvable:$true] %s45_s16  ;;  %s67_s18 = int_to_ptr.vmem [resolvable:$true] %s66_s18 }
  0x26   :  { %s2152_s3 = scalar_lea.vmem %s46_s16, 64  ;;  %p2157_p2 = scmp.lt.s32.totalorder %s46_s16, %s46_s16 }
  0x27   :  { %p2153_p1 = scmp.ne.s32.totalorder %s46_s16, %s2152_s3  ;;  %p2158_p3 = scmp.lt.s32.totalorder %s2152_s3, %s2152_s3 }
  0x29   :  { %p2159_p4 = por %p2158_p3, %p2157_p2 }
  0x2b   :  { %p2160_p5 = pnand %p2159_p4, %p2153_p1 }
  0x2d   :  { %2163 = shalt.err (!%p2160_p5)
}
  0x2e   :  { %48 = dma.hbm_to_vmem [thread:$0]  %s2816_s2, 64, %s46_s16, [#allocation9]  }
  0x2f   :  { %s2172_s21 = scalar_lea.vmem %s67_s18, 2048  ;;  %p2177_p7 = scmp.lt.s32.totalorder %s67_s18, %s67_s18 }
  0x30   :  { %p2173_p6 = scmp.ne.s32.totalorder %s67_s18, %s2172_s21  ;;  %p2178_p8 = scmp.lt.s32.totalorder %s2172_s21, %s2172_s21 }
  0x32   :  { %p2179_p9 = por %p2178_p8, %p2177_p7 }
  0x34   :  { %p2180_p10 = pnand %p2179_p9, %p2173_p6 }
  0x36   :  { %2183 = shalt.err (!%p2180_p10)
}
  0x37   :  { %s2221_s0 = smov 128   ;;  %s2222_s22 = smov 8  }
  0x38   :  { %72 = dma.hbm_to_vmem [thread:$0]  %s2818_s4, 2048, %s67_s18, [#allocation12], %s2221_s0, %s2221_s0, %s2222_s22  }
  0x39   :  { %2204 = dma.done.wait [#allocation6], 512  }
  0x3a   :  { %2205 = vsyncadd [#allocation6], 4294966784 }
  0x3b   :  { %2206 = dma.done.wait [#allocation9], 2112  }
  0x3c   :  { %2207 = vsyncadd [#allocation9], 4294965184 }
  0x3d   :  { %2208 = dma.done.wait [#allocation12], 6144  }
  0x3e   :  { %2209 = vsyncadd [#allocation12], 4294961152  ;;  %v2821_v0 = vmov 0   ;;  %v1848_v1 = vld [vmem:[#allocation8 + $0x64] ss:$16 sps:$4 sm:$0xff]   ;;  %vm243_vm0 = vcmask 523264   ;;  %v123_v54 = vlaneseq }
  0x3f   :  { %288 = vmatprep.mubr.bf16.mxu0 %v2821_v0  ;;  %361 = vmatprep.mubr.bf16.mxu1 %v2821_v0  ;;  %v1850_v2 = vld [vmem:[#allocation8 + $0x6c] ss:$16 sps:$4 sm:$0xff]   ;;  %v1852_v3 = vld [vmem:[#allocation8 + $0x60] ss:$16 sps:$4 sm:$0xff]   ;;  %v1853_v4 = vld [vmem:[#allocation8 + $0x68] ss:$16 sps:$4 sm:$0xff]  }
  0x40   :  { %264 = vmatprep.subr.bf16.mxu0 %v1848_v1  ;;  %337 = vmatprep.subr.bf16.mxu1 %v1850_v2  ;;  %v1854_v5 = vld [vmem:[#allocation8 + $0x44] ss:$16 sps:$4 sm:$0xff]   ;;  %v1856_v6 = vld [vmem:[#allocation8 + $0x4c] ss:$16 sps:$4 sm:$0xff]   ;;  %v1858_v7 = vld [vmem:[#allocation8 + $0x40] ss:$16 sps:$4 sm:$0xff]  }
  0x41   :  { %265 = vmatpush1.bf16.msra.mxu0 %v1852_v3  ;;  %338 = vmatpush1.bf16.msra.mxu1 %v1853_v4  ;;  %v1859_v8 = vld [vmem:[#allocation8 + $0x48] ss:$16 sps:$4 sm:$0xff]   ;;  %v1860_v9 = vld [vmem:[#allocation8 + $0x24] ss:$16 sps:$4 sm:$0xff]   ;;  %v1862_v10 = vld [vmem:[#allocation8 + $0x2c] ss:$16 sps:$4 sm:$0xff]  }
  0x42   :  { %266 = vmatprep.subr.bf16.mxu0 %v1854_v5  ;;  %339 = vmatprep.subr.bf16.mxu1 %v1856_v6  ;;  %v1864_v11 = vld [vmem:[#allocation8 + $0x20] ss:$16 sps:$4 sm:$0xff]   ;;  %v1865_v12 = vld [vmem:[#allocation8 + $0x28] ss:$16 sps:$4 sm:$0xff]   ;;  %v1866_v13 = vld [vmem:[#allocation8 + $0x4] ss:$16 sps:$4 sm:$0xff]  }
  0x43   :  { %v1868_v14 = vld [vmem:[#allocation8 + $0xc] ss:$16 sps:$4 sm:$0xff]   ;;  %v1870_v15 = vld [vmem:[#allocation8] ss:$16 sps:$4 sm:$0xff]   ;;  %v1871_v16 = vld [vmem:[#allocation8 + $0x8] ss:$16 sps:$4 sm:$0xff]  }
  0x44   :  { %v2280_v17 = vld [vmem:[#allocation11 + $0xe4] ss:$16 sps:$4 sm:$0xff]   ;;  %v2282_v18 = vld [vmem:[#allocation11 + $0xec] ss:$16 sps:$4 sm:$0xff]   ;;  %v2284_v20 = vld [vmem:[#allocation11 + $0xe0] ss:$16 sps:$4 sm:$0xff]  }
  0x45   :  { %267 = vmatpush1.bf16.msra.mxu0 %v1858_v7  ;;  %340 = vmatpush1.bf16.msra.mxu1 %v1859_v8  ;;  %v1872_v19 = vld [vmem:[#allocation5] sm:$0xff]   ;;  %v2286_v21 = vld [vmem:[#allocation11 + $0xe8] ss:$16 sps:$4 sm:$0xff]   ;;  %v2288_v22 = vld [vmem:[#allocation11 + $0xc4] ss:$16 sps:$4 sm:$0xff]   ;;  %v2224_v53 = vmov 0.0|0.0  }
  0x46   :  { %268 = vmatprep.subr.bf16.mxu0 %v1860_v9  ;;  %341 = vmatprep.subr.bf16.mxu1 %v1862_v10  ;;  %v2292_v23 = vld [vmem:[#allocation11 + $0xcc] ss:$16 sps:$4 sm:$0xff]   ;;  %v2296_v24 = vld [vmem:[#allocation11 + $0xc0] ss:$16 sps:$4 sm:$0xff]   ;;  %v2300_v25 = vld [vmem:[#allocation11 + $0xc8] ss:$16 sps:$4 sm:$0xff]  }
  0x47   :  { %v2302_v26 = vld [vmem:[#allocation11 + $0xa4] ss:$16 sps:$4 sm:$0xff]   ;;  %v2306_v27 = vld [vmem:[#allocation11 + $0xac] ss:$16 sps:$4 sm:$0xff]   ;;  %v2310_v29 = vld [vmem:[#allocation11 + $0xa0] ss:$16 sps:$4 sm:$0xff]  }
  0x48   :  { %v1885_v28 = vld [vmem:[#allocation5 + $0x8] sm:$0xff]   ;;  %v2320_v32 = vld [vmem:[#allocation11 + $0x8c] ss:$16 sps:$4 sm:$0xff]   ;;  %v2324_v33 = vld [vmem:[#allocation11 + $0x80] ss:$16 sps:$4 sm:$0xff]   ;;  %v124_v55 = vshrl.u32 %v123_v54, 7 }
  0x49   :  { %269 = vmatpush1.bf16.msra.mxu0 %v1864_v11  ;;  %342 = vmatpush1.bf16.msra.mxu1 %v1865_v12  ;;  %v2312_v30 = vld [vmem:[#allocation11 + $0xa8] ss:$16 sps:$4 sm:$0xff]   ;;  %v2316_v31 = vld [vmem:[#allocation11 + $0x84] ss:$16 sps:$4 sm:$0xff]   ;;  %v2334_v36 = vld [vmem:[#allocation11 + $0x6c] ss:$16 sps:$4 sm:$0xff]  }
  0x4a   :  { %270 = vmatprep.subr.bf16.mxu0 %v1866_v13  ;;  %343 = vmatprep.subr.bf16.mxu1 %v1868_v14  ;;  %v2328_v34 = vld [vmem:[#allocation11 + $0x88] ss:$16 sps:$4 sm:$0xff]   ;;  %v2332_v35 = vld [vmem:[#allocation11 + $0x64] ss:$16 sps:$4 sm:$0xff]   ;;  %v1898_v37 = vld [vmem:[#allocation5 + $0x10] sm:$0xff]   ;;  %v133_v56 = vsub.s32 2, %v124_v55 }
  0x4b   :  { %v2338_v38 = vld [vmem:[#allocation11 + $0x60] ss:$16 sps:$4 sm:$0xff]   ;;  %v2342_v39 = vld [vmem:[#allocation11 + $0x68] ss:$16 sps:$4 sm:$0xff]   ;;  %v2344_v40 = vld [vmem:[#allocation11 + $0x44] ss:$16 sps:$4 sm:$0xff]  }
  0x4c   :  { %v2348_v41 = vld [vmem:[#allocation11 + $0x4c] ss:$16 sps:$4 sm:$0xff]   ;;  %v2354_v42 = vld [vmem:[#allocation11 + $0x40] ss:$16 sps:$4 sm:$0xff]   ;;  %v2356_v43 = vld [vmem:[#allocation11 + $0x48] ss:$16 sps:$4 sm:$0xff]  }
  0x4d   :  { %271 = vmatpush1.bf16.msra.mxu0 %v1870_v15  ;;  %344 = vmatpush1.bf16.msra.mxu1 %v1871_v16  ;;  %v2360_v44 = vld [vmem:[#allocation11 + $0x24] ss:$16 sps:$4 sm:$0xff]   ;;  %v2362_v45 = vld [vmem:[#allocation11 + $0x2c] ss:$16 sps:$4 sm:$0xff]   ;;  %v2368_v47 = vld [vmem:[#allocation11 + $0x20] ss:$16 sps:$4 sm:$0xff]  }
  0x4e   :  { %636 = vmatprep.subr.bf16.mxu0 %v2280_v17  ;;  %677 = vmatprep.subr.bf16.mxu1 %v2282_v18  ;;  %v1911_v46 = vld [vmem:[#allocation5 + $0x18] sm:$0xff]   ;;  %v2376_v50 = vld [vmem:[#allocation11 + $0xc] ss:$16 sps:$4 sm:$0xff]   ;;  %v2382_v51 = vld [vmem:[#allocation11] ss:$16 sps:$4 sm:$0xff]   ;;  %v125_v57 = vsub.s32 0, %v124_v55 }
  0x4f   :  { %v2370_v48 = vld [vmem:[#allocation11 + $0x28] ss:$16 sps:$4 sm:$0xff]   ;;  %v2374_v49 = vld [vmem:[#allocation11 + $0x4] ss:$16 sps:$4 sm:$0xff]   ;;  %v137_v58 = vsub.s32 3, %v124_v55  ;;  %v129_v63 = vsub.s32 1, %v124_v55 }
  0x50   :  { %1715 = vmatmul.mubr.msk.bf16.vlgmr.msra.gmra.mxu0 %vm243_vm0, %v1872_v19  ;;  %1719 = vmatmul.mubr.msk.bf16.vlgmr.msra.gmra.mxu1 %vm243_vm0, %v1872_v19  ;;  %v2384_v52 = vld [vmem:[#allocation11 + $0x8] ss:$16 sps:$4 sm:$0xff]   ;;  %v121_v59 = vld [vmem:[#allocation10] sm:$0xf]  ;;  %vm2226_vm1 = vmmov 0   ;;  %s2227_s25 = smov [#allocation14]  }
  0x51   :  { %637 = vmatpush1.bf16.msra.mxu0 %v2284_v20  ;;  %678 = vmatpush1.bf16.msra.mxu1 %v2286_v21  ;;  %v2432_v62 = vrot.slane %v121_v59, %v133_v56  ;;  %v126_v3 = vrot.slane %v121_v59, %v125_v57  ;;  %v2438_v4 = vrot.slane %v121_v59, %v137_v58  ;;  %s1677_s26 = sshll.u32 %s2227_s25, 4  ;;  %s1678_s26 = int_to_ptr.vmem [resolvable:$true] %s1677_s26 }
  0x52   :  { %638 = vmatprep.subr.bf16.mxu0 %v2288_v22  ;;  %679 = vmatprep.subr.bf16.mxu1 %v2292_v23  ;;  %v130_v7 = vrot.slane %v121_v59, %v129_v63  ;;  %s2184_s27 = scalar_lea.vmem %s1678_s26, 128  ;;  %p2189_p12 = scmp.lt.s32.totalorder %s1678_s26, %s1678_s26 }
  0x53   :  { %298 = vmatprep.mubr.bf16.mxu0 %v2821_v0  ;;  %371 = vmatprep.mubr.bf16.mxu1 %v2821_v0  ;;  %p2185_p11 = scmp.ne.s32.totalorder %s1678_s26, %s2184_s27  ;;  %p2190_p13 = scmp.lt.s32.totalorder %s2184_s27, %s2184_s27 }
  0x55   :  { %639 = vmatpush1.bf16.msra.mxu0 %v2296_v24  ;;  %680 = vmatpush1.bf16.msra.mxu1 %v2300_v25  ;;  %p2191_p0 = por %p2190_p13, %p2189_p12 }
  0x56   :  { %640 = vmatprep.subr.bf16.mxu0 %v2302_v26  ;;  %681 = vmatprep.subr.bf16.mxu1 %v2306_v27 }
  0x57   :  { %p2192_p1 = pnand %p2191_p0, %p2185_p11 }
  0x58   :  { %1716 = vmatmul.mubr.msk.bf16.gmra.mxu0 %vm243_vm0, %v1885_v28  ;;  %1720 = vmatmul.mubr.msk.bf16.gmra.mxu1 %vm243_vm0, %v1885_v28 }
  0x59   :  { %641 = vmatpush1.bf16.msra.mxu0 %v2310_v29  ;;  %682 = vmatpush1.bf16.msra.mxu1 %v2312_v30 }
  0x5a   :  { %642 = vmatprep.subr.bf16.mxu0 %v2316_v31  ;;  %683 = vmatprep.subr.bf16.mxu1 %v2320_v32 }
  0x5b   :  { %308 = vmatprep.mubr.bf16.mxu0 %v2821_v0  ;;  %381 = vmatprep.mubr.bf16.mxu1 %v2821_v0 }
  0x5d   :  { %643 = vmatpush1.bf16.msra.mxu0 %v2324_v33  ;;  %684 = vmatpush1.bf16.msra.mxu1 %v2328_v34 }
  0x5e   :  { %644 = vmatprep.subr.bf16.mxu0 %v2332_v35  ;;  %685 = vmatprep.subr.bf16.mxu1 %v2334_v36 }
  0x60   :  { %1717 = vmatmul.mubr.msk.bf16.gmra.mxu0 %vm243_vm0, %v1898_v37  ;;  %1721 = vmatmul.mubr.msk.bf16.gmra.mxu1 %vm243_vm0, %v1898_v37 }
  0x61   :  { %645 = vmatpush1.bf16.msra.mxu0 %v2338_v38  ;;  %686 = vmatpush1.bf16.msra.mxu1 %v2342_v39 }
  0x62   :  { %646 = vmatprep.subr.bf16.mxu0 %v2344_v40  ;;  %687 = vmatprep.subr.bf16.mxu1 %v2348_v41 }
  0x63   :  { %318 = vmatprep.mubr.bf16.mxu0 %v2821_v0  ;;  %391 = vmatprep.mubr.bf16.mxu1 %v2821_v0 }
  0x65   :  { %647 = vmatpush1.bf16.msra.mxu0 %v2354_v42  ;;  %688 = vmatpush1.bf16.msra.mxu1 %v2356_v43 }
  0x66   :  { %648 = vmatprep.subr.bf16.mxu0 %v2360_v44  ;;  %689 = vmatprep.subr.bf16.mxu1 %v2362_v45 }
  0x68   :  { %1718 = vmatmul.mubr.msk.bf16.gmra.mxu0 %vm243_vm0, %v1911_v46  ;;  %1722 = vmatmul.mubr.msk.bf16.gmra.mxu1 %vm243_vm0, %v1911_v46 }
  0x69   :  { %649 = vmatpush1.bf16.msra.mxu0 %v2368_v47  ;;  %690 = vmatpush1.bf16.msra.mxu1 %v2370_v48 }
  0x6a   :  { %650 = vmatprep.subr.bf16.mxu0 %v2374_v49  ;;  %691 = vmatprep.subr.bf16.mxu1 %v2376_v50 }
  0x6b   :  { %668 = vmatprep.mubr.bf16.mxu0 %v2821_v0  ;;  %709 = vmatprep.mubr.bf16.mxu1 %v2821_v0 }
  0x6d   :  { %651 = vmatpush1.bf16.msra.mxu0 %v2382_v51  ;;  %692 = vmatpush1.bf16.msra.mxu1 %v2384_v52 }
  0x6e   :  { %754 = vmatprep.subr.bf16.mxu0 %v2280_v17  ;;  %795 = vmatprep.subr.bf16.mxu1 %v2282_v18 }
  0x70   :  { %669 = vmatmul.mubr.bf16.vlgmr.msra.gmra.mxu0 %v2224_v53  ;;  %710 = vmatmul.mubr.bf16.vlgmr.msra.gmra.mxu1 %v2224_v53 }
  0x71   :  { %755 = vmatpush1.bf16.msra.mxu0 %v2284_v20  ;;  %796 = vmatpush1.bf16.msra.mxu1 %v2286_v21 }
  0x72   :  { %756 = vmatprep.subr.bf16.mxu0 %v2288_v22  ;;  %797 = vmatprep.subr.bf16.mxu1 %v2292_v23 }
  0x73   :  { %786 = vmatprep.mubr.bf16.mxu0 %v2821_v0  ;;  %827 = vmatprep.mubr.bf16.mxu1 %v2821_v0 }
  0x75   :  { %757 = vmatpush1.bf16.msra.mxu0 %v2296_v24  ;;  %798 = vmatpush1.bf16.msra.mxu1 %v2300_v25 }
  0x76   :  { %758 = vmatprep.subr.bf16.mxu0 %v2302_v26  ;;  %799 = vmatprep.subr.bf16.mxu1 %v2306_v27 }
  0x79   :  { %759 = vmatpush1.bf16.msra.mxu0 %v2310_v29  ;;  %800 = vmatpush1.bf16.msra.mxu1 %v2312_v30 }
  0x7a   :  { %760 = vmatprep.subr.bf16.mxu0 %v2316_v31  ;;  %801 = vmatprep.subr.bf16.mxu1 %v2320_v32 }
  0x7d   :  { %761 = vmatpush1.bf16.msra.mxu0 %v2324_v33  ;;  %802 = vmatpush1.bf16.msra.mxu1 %v2328_v34 }
  0x7e   :  { %762 = vmatprep.subr.bf16.mxu0 %v2332_v35  ;;  %803 = vmatprep.subr.bf16.mxu1 %v2334_v36 }
  0x81   :  { %763 = vmatpush1.bf16.msra.mxu0 %v2338_v38  ;;  %804 = vmatpush1.bf16.msra.mxu1 %v2342_v39 }
  0x82   :  { %764 = vmatprep.subr.bf16.mxu0 %v2344_v40  ;;  %805 = vmatprep.subr.bf16.mxu1 %v2348_v41 }
  0x85   :  { %765 = vmatpush1.bf16.msra.mxu0 %v2354_v42  ;;  %806 = vmatpush1.bf16.msra.mxu1 %v2356_v43 }
  0x86   :  { %766 = vmatprep.subr.bf16.mxu0 %v2360_v44  ;;  %807 = vmatprep.subr.bf16.mxu1 %v2362_v45 }
  0x89   :  { %767 = vmatpush1.bf16.msra.mxu0 %v2368_v47  ;;  %808 = vmatpush1.bf16.msra.mxu1 %v2370_v48 }
  0x8a   :  { %768 = vmatprep.subr.bf16.mxu0 %v2374_v49  ;;  %809 = vmatprep.subr.bf16.mxu1 %v2376_v50 }
  0x8d   :  { %769 = vmatpush1.bf16.msra.mxu0 %v2382_v51  ;;  %810 = vmatpush1.bf16.msra.mxu1 %v2384_v52 }
  0x8e   :  { %872 = vmatprep.subr.bf16.mxu0 %v2280_v17  ;;  %913 = vmatprep.subr.bf16.mxu1 %v2282_v18 }
 0x110   :  { %v2428_v60 = vpop.f32.mrf.mxu0  ;;  %v2430_v61 = vpop.f32.mrf.mxu1 }
 0x112   :  { %v2434_v1 = vpop.f32.mrf.mxu0  ;;  %v2436_v2 = vpop.f32.mrf.mxu1 }
 0x114   :  { %v294_v5 = vpop.f32.mrf.mxu0  ;;  %v367_v6 = vpop.f32.mrf.mxu1 }
 0x115   :  { %v2440_v8 = vadd.f32 %v294_v5, %v126_v3  ;;  %v2443_v9 = vadd.f32 %v367_v6, %v2432_v62 }
 0x116   :  { %v296_v10 = vpop.f32.mrf.mxu0  ;;  %v369_v11 = vpop.f32.mrf.mxu1 }
 0x117   :  { %v2445_v12 = vadd.f32 %v296_v10, %v130_v7  ;;  %v2448_v13 = vadd.f32 %v369_v11, %v2438_v4 }
 0x118   :  { %v300_v14 = vpop.f32.mrf.mxu0  ;;  %v373_v15 = vpop.f32.mrf.mxu1 }
 0x119   :  { %v2450_v16 = vadd.f32 %v300_v14, %v126_v3  ;;  %v2453_v19 = vadd.f32 %v373_v15, %v2432_v62 }
 0x11a   :  { %v302_v28 = vpop.f32.mrf.mxu0  ;;  %v375_v37 = vpop.f32.mrf.mxu1 }
 0x11b   :  { %2823 = vst [vmem:[#allocation19_spill] sm:$0xff] %v2453_v19  ;;  %v2455_v46 = vadd.f32 %v302_v28, %v130_v7  ;;  %v2458_v53 = vadd.f32 %v375_v37, %v2438_v4 }
 0x11c   :  { %v304_v54 = vpop.f32.mrf.mxu0  ;;  %v377_v55 = vpop.f32.mrf.mxu1 }
 0x11d   :  { %v2460_v56 = vadd.f32 %v304_v54, %v126_v3  ;;  %v2463_v57 = vadd.f32 %v377_v55, %v2432_v62 }
 0x11e   :  { %v306_v58 = vpop.f32.mrf.mxu0  ;;  %v379_v59 = vpop.f32.mrf.mxu1 }
 0x11f   :  { %2824 = vst [vmem:[#allocation20_spill] sm:$0xff] %v2460_v56  ;;  %2825 = vst [vmem:[#allocation21_spill] sm:$0xff] %v2463_v57  ;;  %v2465_v63 = vadd.f32 %v306_v58, %v130_v7  ;;  %v2468_v5 = vadd.f32 %v379_v59, %v2438_v4 }
 0x120   :  { %v310_v6 = vpop.f32.mrf.mxu0  ;;  %v383_v10 = vpop.f32.mrf.mxu1 }
 0x121   :  { %2826 = vst [vmem:[#allocation22_spill] sm:$0xff] %v2465_v63  ;;  %2827 = vst [vmem:[#allocation23_spill] sm:$0xff] %v2468_v5  ;;  %v2470_v11 = vadd.f32 %v310_v6, %v126_v3  ;;  %v2473_v14 = vadd.f32 %v383_v10, %v2432_v62 }
 0x122   :  { %v312_v15 = vpop.f32.mrf.mxu0  ;;  %v385_v28 = vpop.f32.mrf.mxu1 }
 0x123   :  { %2828 = vst [vmem:[#allocation24_spill] sm:$0xff] %v2470_v11  ;;  %2829 = vst [vmem:[#allocation25_spill] sm:$0xff] %v2473_v14  ;;  %v2475_v37 = vadd.f32 %v312_v15, %v130_v7  ;;  %v2478_v54 = vadd.f32 %v385_v28, %v2438_v4 }
 0x124   :  { %v314_v55 = vpop.f32.mrf.mxu0  ;;  %v387_v58 = vpop.f32.mrf.mxu1 }
 0x125   :  { %2830 = vst [vmem:[#allocation26_spill] sm:$0xff] %v2475_v37  ;;  %2831 = vst [vmem:[#allocation27_spill] sm:$0xff] %v2478_v54  ;;  %v2480_v0 = vadd.f32 %v314_v55, %v126_v3  ;;  %v2483_v59 = vadd.f32 %v387_v58, %v2432_v62 }
 0x126   :  { %v316_v57 = vpop.f32.mrf.mxu0  ;;  %v389_v6 = vpop.f32.mrf.mxu1 }
 0x127   :  { %2832 = vst [vmem:[#allocation28_spill] sm:$0xff] %v2480_v0  ;;  %2833 = vst [vmem:[#allocation29_spill] sm:$0xff] %v2483_v59  ;;  %v2485_v11 = vadd.f32 %v316_v57, %v130_v7  ;;  %v2488_v10 = vadd.f32 %v389_v6, %v2438_v4 }
 0x128   :  { %v320_v14 = vpop.f32.mrf.mxu0  ;;  %v393_v15 = vpop.f32.mrf.mxu1 }
 0x129   :  { %2834 = vst [vmem:[#allocation30_spill] sm:$0xff] %v2485_v11  ;;  %2835 = vst [vmem:[#allocation31_spill] sm:$0xff] %v2488_v10  ;;  %v2490_v37 = vadd.f32 %v320_v14, %v126_v3  ;;  %v2493_v28 = vadd.f32 %v393_v15, %v2432_v62 }
 0x12a   :  { %v322_v54 = vpop.f32.mrf.mxu0  ;;  %v395_v55 = vpop.f32.mrf.mxu1 }
 0x12b   :  { %2836 = vst [vmem:[#allocation32_spill] sm:$0xff] %v2490_v37  ;;  %2837 = vst [vmem:[#allocation33_spill] sm:$0xff] %v2493_v28  ;;  %v2495_v0 = vadd.f32 %v322_v54, %v130_v7  ;;  %v2498_v58 = vadd.f32 %v395_v55, %v2438_v4  ;;  %v291_v37 = vadd.f32 %v2428_v60, %v126_v3 }
 0x12c   :  { %v324_v59 = vpop.f32.mrf.mxu0  ;;  %v397_v57 = vpop.f32.mrf.mxu1  ;;  %v293_v55 = vadd.f32 %v2434_v1, %v130_v7 }
 0x12d   :  { %2838 = vst [vmem:[#allocation34_spill] sm:$0xff] %v2495_v0  ;;  %2839 = vst [vmem:[#allocation35_spill] sm:$0xff] %v2498_v58  ;;  %v2500_v11 = vadd.f32 %v324_v59, %v126_v3  ;;  %v2503_v6 = vadd.f32 %v397_v57, %v2432_v62  ;;  %v366_v3 = vadd.f32 %v2436_v2, %v2438_v4 }
 0x12e   :  { %v326_v10 = vpop.f32.mrf.mxu0  ;;  %v399_v14 = vpop.f32.mrf.mxu1 }
 0x12f   :  { %2840 = vst [vmem:[#allocation36_spill] sm:$0xff] %v2500_v11  ;;  %2841 = vst [vmem:[#allocation37_spill] sm:$0xff] %v2503_v6  ;;  %v2506_v15 = vadd.f32 %v326_v10, %v130_v7  ;;  %v2509_v28 = vadd.f32 %v399_v14, %v2438_v4  ;;  %v364_v14 = vadd.f32 %v2430_v61, %v2432_v62 }
 0x130   :  { %v670_v54 = vpop.f32.mrf.mxu0  ;;  %v711_v0 = vpop.f32.mrf.mxu1 }
 0x131   :  { %v718_v58 = vadd.f32 %v670_v54, %v291_v37  ;;  %v720_v37 = vadd.f32 %v711_v0, %v364_v14 }
 0x132   :  { %v672_v5 = vpop.f32.mrf.mxu0  ;;  %v713_v59 = vpop.f32.mrf.mxu1 }
 0x133   :  { %v1755_v11 = vmul.f32 -1.442695, %v718_v58  ;;  %v719_v63 = vadd.f32 %v672_v5, %v293_v55  ;;  %v721_v10 = vadd.f32 %v713_v59, %v366_v3 }
 0x134   :  { %v674_v57 = vpop.f32.mrf.mxu0  ;;  %v715_v6 = vpop.f32.mrf.mxu1 }
 0x135   :  { %1924 = vpow2.f32 %v1755_v11  ;;  %v1756_v56 = vmul.f32 -1.442695, %v719_v63  ;;  %v1757_v1 = vmul.f32 -1.442695, %v721_v10  ;;  %v2842_v57 = vmov 0  }
 0x136   :  { %v675_v19 = vpop.f32.mrf.mxu0  ;;  %v716_v60 = vpop.f32.mrf.mxu1 }
 0x137   :  { %1926 = vpow2.f32 %v1756_v56 }
 0x138   :  { %1928 = vpow2.f32 %v1757_v1 }
 0x142   :  { %v1925_v7 = vpop.eup %1924 }
 0x143   :  { %v725_v54 = vadd.f32 1.0, %v1925_v7 }
 0x144   :  { %v1927_v58 = vpop.eup %1926 }
 0x145   :  { %1930 = vrcp.f32 %v725_v54  ;;  %v731_v5 = vadd.f32 1.0, %v1927_v58  ;;  %v1929_v19 = vpop.eup %1928 }
 0x146   :  { %1932 = vtanh.f32 %v720_v37  ;;  %v738_v6 = vadd.f32 1.0, %v1929_v19 }
 0x147   :  { %1934 = vrcp.f32 %v731_v5 }
 0x148   :  { %1936 = vrcp.f32 %v738_v6 }
 0x152   :  { %v1931_v63 = vpop.eup %1930 }
 0x153   :  { %v1933_v56 = vpop.eup %1932 }
 0x154   :  { %v1935_v11 = vpop.eup %1934  ;;  %v742_v4 = vmul.f32 %v1933_v56, %v1931_v63 }
 0x155   :  { %v741_v2 = vmul.f32 0.0, %v1935_v11  ;;  %v1937_v0 = vpop.eup %1936 }
 0x157   :  { %v2516_v55 = vadd.f32 %v742_v4, %v741_v2 }
 0x159   :  { %1938 = vtanh.f32 %v2516_v55 }
 0x166   :  { %v1939_v61 = vpop.eup %1938 }
 0x167   :  { %v745_v62 = vmul.f32 %v1939_v61, %v1937_v0 }
 0x169   :  { %v753_v59 = vpack.c.bf16 %v745_v62, %v745_v62 }
 0x16b   :  { %787 = vmatmul.mubr.bf16.vlgmr.msra.gmra.mxu0 %v753_v59  ;;  %828 = vmatmul.mubr.bf16.vlgmr.msra.gmra.mxu1 %v753_v59 }
 0x16c   :  { %873 = vmatpush1.bf16.msra.mxu0 %v2284_v20  ;;  %914 = vmatpush1.bf16.msra.mxu1 %v2286_v21 }
 0x16d   :  { %874 = vmatprep.subr.bf16.mxu0 %v2288_v22  ;;  %915 = vmatprep.subr.bf16.mxu1 %v2292_v23 }
 0x16e   :  { %904 = vmatprep.mubr.bf16.mxu0 %v2842_v57  ;;  %945 = vmatprep.mubr.bf16.mxu1 %v2842_v57 }
 0x170   :  { %875 = vmatpush1.bf16.msra.mxu0 %v2296_v24  ;;  %916 = vmatpush1.bf16.msra.mxu1 %v2300_v25 }
 0x171   :  { %876 = vmatprep.subr.bf16.mxu0 %v2302_v26  ;;  %917 = vmatprep.subr.bf16.mxu1 %v2306_v27 }
 0x174   :  { %877 = vmatpush1.bf16.msra.mxu0 %v2310_v29  ;;  %918 = vmatpush1.bf16.msra.mxu1 %v2312_v30 }
 0x175   :  { %878 = vmatprep.subr.bf16.mxu0 %v2316_v31  ;;  %919 = vmatprep.subr.bf16.mxu1 %v2320_v32 }
 0x178   :  { %879 = vmatpush1.bf16.msra.mxu0 %v2324_v33  ;;  %920 = vmatpush1.bf16.msra.mxu1 %v2328_v34 }
 0x179   :  { %880 = vmatprep.subr.bf16.mxu0 %v2332_v35  ;;  %921 = vmatprep.subr.bf16.mxu1 %v2334_v36 }
 0x17c   :  { %881 = vmatpush1.bf16.msra.mxu0 %v2338_v38  ;;  %922 = vmatpush1.bf16.msra.mxu1 %v2342_v39 }
 0x17d   :  { %882 = vmatprep.subr.bf16.mxu0 %v2344_v40  ;;  %923 = vmatprep.subr.bf16.mxu1 %v2348_v41 }
 0x180   :  { %883 = vmatpush1.bf16.msra.mxu0 %v2354_v42  ;;  %924 = vmatpush1.bf16.msra.mxu1 %v2356_v43 }
 0x181   :  { %884 = vmatprep.subr.bf16.mxu0 %v2360_v44  ;;  %925 = vmatprep.subr.bf16.mxu1 %v2362_v45 }
 0x184   :  { %885 = vmatpush1.bf16.msra.mxu0 %v2368_v47  ;;  %926 = vmatpush1.bf16.msra.mxu1 %v2370_v48 }
 0x185   :  { %886 = vmatprep.subr.bf16.mxu0 %v2374_v49  ;;  %927 = vmatprep.subr.bf16.mxu1 %v2376_v50 }
 0x188   :  { %887 = vmatpush1.bf16.msra.mxu0 %v2382_v51  ;;  %928 = vmatpush1.bf16.msra.mxu1 %v2384_v52 }
 0x189   :  { %990 = vmatprep.subr.bf16.mxu0 %v2280_v17  ;;  %1031 = vmatprep.subr.bf16.mxu1 %v2282_v18 }
 0x22b   :  { %v788_v60 = vpop.f32.mrf.mxu0  ;;  %v829_v3 = vpop.f32.mrf.mxu1 }
 0x22c   :  { %v836_v10 = vadd.f32 %v788_v60, %v2440_v8  ;;  %v838_v11 = vadd.f32 %v829_v3, %v2443_v9 }
 0x22d   :  { %v790_v14 = vpop.f32.mrf.mxu0  ;;  %v831_v1 = vpop.f32.mrf.mxu1 }
 0x22e   :  { %v1758_v7 = vmul.f32 -1.442695, %v836_v10  ;;  %v837_v37 = vadd.f32 %v790_v14, %v2445_v12  ;;  %v839_v56 = vadd.f32 %v831_v1, %v2448_v13 }
 0x22f   :  { %v792_v54 = vpop.f32.mrf.mxu0  ;;  %v833_v58 = vpop.f32.mrf.mxu1 }
 0x230   :  { %1940 = vpow2.f32 %v1758_v7  ;;  %v1759_v5 = vmul.f32 -1.442695, %v837_v37  ;;  %v1760_v6 = vmul.f32 -1.442695, %v839_v56 }
 0x231   :  { %v793_v19 = vpop.f32.mrf.mxu0  ;;  %v834_v63 = vpop.f32.mrf.mxu1 }
 0x232   :  { %1942 = vpow2.f32 %v1759_v5 }
 0x233   :  { %1944 = vtanh.f32 %v838_v11 }
 0x234   :  { %1946 = vpow2.f32 %v1760_v6 }
 0x23d   :  { %v1941_v2 = vpop.eup %1940 }
 0x23e   :  { %v843_v4 = vadd.f32 1.0, %v1941_v2 }
 0x23f   :  { %v1943_v8 = vpop.eup %1942 }
 0x240   :  { %1948 = vrcp.f32 %v843_v4  ;;  %v849_v0 = vadd.f32 1.0, %v1943_v8  ;;  %v1945_v12 = vpop.eup %1944 }
 0x241   :  { %v1947_v61 = vpop.eup %1946 }
 0x242   :  { %1950 = vrcp.f32 %v849_v0  ;;  %v856_v10 = vadd.f32 1.0, %v1947_v61  ;;  %v2843_v0 = vld [vmem:[#allocation19_spill] sm:$0xff] }
 0x244   :  { %1952 = vrcp.f32 %v856_v10 }
 0x24d   :  { %v1949_v62 = vpop.eup %1948 }
 0x24e   :  { %v860_v59 = vmul.f32 %v1949_v62, %v1945_v12 }
 0x24f   :  { %v1951_v60 = vpop.eup %1950 }
 0x250   :  { %v859_v14 = vmul.f32 %v1951_v60, %v2516_v55 }
 0x251   :  { %v1953_v9 = vpop.eup %1952 }
 0x252   :  { %v2558_v13 = vadd.f32 %v860_v59, %v859_v14 }
 0x254   :  { %1954 = vtanh.f32 %v2558_v13 }
 0x261   :  { %v1955_v3 = vpop.eup %1954 }
 0x262   :  { %v863_v1 = vmul.f32 %v1955_v3, %v1953_v9 }
 0x264   :  { %v871_v7 = vpack.c.bf16 %v863_v1, %v863_v1 }
 0x266   :  { %905 = vmatmul.mubr.bf16.vlgmr.msra.gmra.mxu0 %v871_v7  ;;  %946 = vmatmul.mubr.bf16.vlgmr.msra.gmra.mxu1 %v871_v7 }
 0x267   :  { %991 = vmatpush1.bf16.msra.mxu0 %v2284_v20  ;;  %1032 = vmatpush1.bf16.msra.mxu1 %v2286_v21 }
 0x268   :  { %992 = vmatprep.subr.bf16.mxu0 %v2288_v22  ;;  %1033 = vmatprep.subr.bf16.mxu1 %v2292_v23 }
 0x269   :  { %1022 = vmatprep.mubr.bf16.mxu0 %v2842_v57  ;;  %1063 = vmatprep.mubr.bf16.mxu1 %v2842_v57 }
 0x26b   :  { %993 = vmatpush1.bf16.msra.mxu0 %v2296_v24  ;;  %1034 = vmatpush1.bf16.msra.mxu1 %v2300_v25 }
 0x26c   :  { %994 = vmatprep.subr.bf16.mxu0 %v2302_v26  ;;  %1035 = vmatprep.subr.bf16.mxu1 %v2306_v27 }
 0x26f   :  { %995 = vmatpush1.bf16.msra.mxu0 %v2310_v29  ;;  %1036 = vmatpush1.bf16.msra.mxu1 %v2312_v30 }
 0x270   :  { %996 = vmatprep.subr.bf16.mxu0 %v2316_v31  ;;  %1037 = vmatprep.subr.bf16.mxu1 %v2320_v32 }
 0x273   :  { %997 = vmatpush1.bf16.msra.mxu0 %v2324_v33  ;;  %1038 = vmatpush1.bf16.msra.mxu1 %v2328_v34 }
 0x274   :  { %998 = vmatprep.subr.bf16.mxu0 %v2332_v35  ;;  %1039 = vmatprep.subr.bf16.mxu1 %v2334_v36 }
 0x277   :  { %999 = vmatpush1.bf16.msra.mxu0 %v2338_v38  ;;  %1040 = vmatpush1.bf16.msra.mxu1 %v2342_v39 }
 0x278   :  { %1000 = vmatprep.subr.bf16.mxu0 %v2344_v40  ;;  %1041 = vmatprep.subr.bf16.mxu1 %v2348_v41 }
 0x27b   :  { %1001 = vmatpush1.bf16.msra.mxu0 %v2354_v42  ;;  %1042 = vmatpush1.bf16.msra.mxu1 %v2356_v43 }
 0x27c   :  { %1002 = vmatprep.subr.bf16.mxu0 %v2360_v44  ;;  %1043 = vmatprep.subr.bf16.mxu1 %v2362_v45 }
 0x27f   :  { %1003 = vmatpush1.bf16.msra.mxu0 %v2368_v47  ;;  %1044 = vmatpush1.bf16.msra.mxu1 %v2370_v48 }
 0x280   :  { %1004 = vmatprep.subr.bf16.mxu0 %v2374_v49  ;;  %1045 = vmatprep.subr.bf16.mxu1 %v2376_v50 }
 0x283   :  { %1005 = vmatpush1.bf16.msra.mxu0 %v2382_v51  ;;  %1046 = vmatpush1.bf16.msra.mxu1 %v2384_v52 }
 0x284   :  { %1108 = vmatprep.subr.bf16.mxu0 %v2280_v17  ;;  %1149 = vmatprep.subr.bf16.mxu1 %v2282_v18 }
 0x326   :  { %v906_v55 = vpop.f32.mrf.mxu0  ;;  %v947_v37 = vpop.f32.mrf.mxu1 }
 0x327   :  { %v954_v54 = vadd.f32 %v906_v55, %v2450_v16  ;;  %v956_v12 = vadd.f32 %v947_v37, %v2843_v0 }
 0x328   :  { %v908_v58 = vpop.f32.mrf.mxu0  ;;  %v949_v5 = vpop.f32.mrf.mxu1 }
 0x329   :  { %v1761_v19 = vmul.f32 -1.442695, %v954_v54  ;;  %v955_v63 = vadd.f32 %v908_v58, %v2455_v46  ;;  %v957_v8 = vadd.f32 %v949_v5, %v2458_v53 }
 0x32a   :  { %v910_v56 = vpop.f32.mrf.mxu0  ;;  %v951_v11 = vpop.f32.mrf.mxu1 }
 0x32b   :  { %1956 = vpow2.f32 %v1761_v19  ;;  %v1762_v6 = vmul.f32 -1.442695, %v955_v63  ;;  %v1763_v61 = vmul.f32 -1.442695, %v957_v8  ;;  %v2844_v19 = vld [vmem:[#allocation20_spill] sm:$0xff] }
 0x32c   :  { %v911_v2 = vpop.f32.mrf.mxu0  ;;  %v952_v4 = vpop.f32.mrf.mxu1 }
 0x32d   :  { %1958 = vpow2.f32 %v1762_v6  ;;  %v2845_v2 = vld [vmem:[#allocation22_spill] sm:$0xff] }
 0x32e   :  { %1960 = vtanh.f32 %v956_v12 }
 0x32f   :  { %1962 = vpow2.f32 %v1763_v61 }
 0x338   :  { %v1957_v62 = vpop.eup %1956 }
 0x339   :  { %v961_v59 = vadd.f32 1.0, %v1957_v62 }
 0x33a   :  { %v1959_v16 = vpop.eup %1958 }
 0x33b   :  { %1964 = vrcp.f32 %v961_v59  ;;  %v967_v60 = vadd.f32 1.0, %v1959_v16  ;;  %v1961_v46 = vpop.eup %1960  ;;  %v2846_v59 = vld [vmem:[#allocation23_spill] sm:$0xff]  ;;  %v2847_v16 = vld [vmem:[#allocation21_spill] sm:$0xff] }
 0x33c   :  { %v1963_v10 = vpop.eup %1962 }
 0x33d   :  { %1966 = vrcp.f32 %v967_v60  ;;  %v974_v1 = vadd.f32 1.0, %v1963_v10 }
 0x33f   :  { %1968 = vrcp.f32 %v974_v1 }
 0x348   :  { %v1965_v14 = vpop.eup %1964 }
 0x349   :  { %v978_v9 = vmul.f32 %v1965_v14, %v1961_v46 }
 0x34a   :  { %v1967_v3 = vpop.eup %1966 }
 0x34b   :  { %v977_v7 = vmul.f32 %v1967_v3, %v2558_v13 }
 0x34c   :  { %v1969_v55 = vpop.eup %1968 }
 0x34d   :  { %v2600_v53 = vadd.f32 %v978_v9, %v977_v7 }
 0x34f   :  { %1970 = vtanh.f32 %v2600_v53 }
 0x35c   :  { %v1971_v37 = vpop.eup %1970 }
 0x35d   :  { %v981_v54 = vmul.f32 %v1971_v37, %v1969_v55 }
 0x35f   :  { %v989_v58 = vpack.c.bf16 %v981_v54, %v981_v54 }
 0x361   :  { %1023 = vmatmul.mubr.bf16.vlgmr.msra.gmra.mxu0 %v989_v58  ;;  %1064 = vmatmul.mubr.bf16.vlgmr.msra.gmra.mxu1 %v989_v58 }
 0x362   :  { %1109 = vmatpush1.bf16.msra.mxu0 %v2284_v20  ;;  %1150 = vmatpush1.bf16.msra.mxu1 %v2286_v21 }
 0x363   :  { %1110 = vmatprep.subr.bf16.mxu0 %v2288_v22  ;;  %1151 = vmatprep.subr.bf16.mxu1 %v2292_v23 }
 0x364   :  { %1140 = vmatprep.mubr.bf16.mxu0 %v2842_v57  ;;  %1181 = vmatprep.mubr.bf16.mxu1 %v2842_v57 }
 0x366   :  { %1111 = vmatpush1.bf16.msra.mxu0 %v2296_v24  ;;  %1152 = vmatpush1.bf16.msra.mxu1 %v2300_v25 }
 0x367   :  { %1112 = vmatprep.subr.bf16.mxu0 %v2302_v26  ;;  %1153 = vmatprep.subr.bf16.mxu1 %v2306_v27 }
 0x36a   :  { %1113 = vmatpush1.bf16.msra.mxu0 %v2310_v29  ;;  %1154 = vmatpush1.bf16.msra.mxu1 %v2312_v30 }
 0x36b   :  { %1114 = vmatprep.subr.bf16.mxu0 %v2316_v31  ;;  %1155 = vmatprep.subr.bf16.mxu1 %v2320_v32 }
 0x36e   :  { %1115 = vmatpush1.bf16.msra.mxu0 %v2324_v33  ;;  %1156 = vmatpush1.bf16.msra.mxu1 %v2328_v34 }
 0x36f   :  { %1116 = vmatprep.subr.bf16.mxu0 %v2332_v35  ;;  %1157 = vmatprep.subr.bf16.mxu1 %v2334_v36 }
 0x372   :  { %1117 = vmatpush1.bf16.msra.mxu0 %v2338_v38  ;;  %1158 = vmatpush1.bf16.msra.mxu1 %v2342_v39 }
 0x373   :  { %1118 = vmatprep.subr.bf16.mxu0 %v2344_v40  ;;  %1159 = vmatprep.subr.bf16.mxu1 %v2348_v41 }
 0x376   :  { %1119 = vmatpush1.bf16.msra.mxu0 %v2354_v42  ;;  %1160 = vmatpush1.bf16.msra.mxu1 %v2356_v43 }
 0x377   :  { %1120 = vmatprep.subr.bf16.mxu0 %v2360_v44  ;;  %1161 = vmatprep.subr.bf16.mxu1 %v2362_v45 }
 0x37a   :  { %1121 = vmatpush1.bf16.msra.mxu0 %v2368_v47  ;;  %1162 = vmatpush1.bf16.msra.mxu1 %v2370_v48 }
 0x37b   :  { %1122 = vmatprep.subr.bf16.mxu0 %v2374_v49  ;;  %1163 = vmatprep.subr.bf16.mxu1 %v2376_v50 }
 0x37e   :  { %1123 = vmatpush1.bf16.msra.mxu0 %v2382_v51  ;;  %1164 = vmatpush1.bf16.msra.mxu1 %v2384_v52 }
 0x37f   :  { %1226 = vmatprep.subr.bf16.mxu0 %v2280_v17  ;;  %1267 = vmatprep.subr.bf16.mxu1 %v2282_v18 }
 0x421   :  { %v1024_v13 = vpop.f32.mrf.mxu0  ;;  %v1065_v5 = vpop.f32.mrf.mxu1 }
 0x422   :  { %v1072_v63 = vadd.f32 %v1024_v13, %v2844_v19  ;;  %v1074_v18 = vadd.f32 %v1065_v5, %v2847_v16 }
 0x423   :  { %v1026_v56 = vpop.f32.mrf.mxu0  ;;  %v1067_v11 = vpop.f32.mrf.mxu1 }
 0x424   :  { %v1764_v6 = vmul.f32 -1.442695, %v1072_v63  ;;  %v1073_v4 = vadd.f32 %v1026_v56, %v2845_v2  ;;  %v1075_v17 = vadd.f32 %v1067_v11, %v2846_v59 }
 0x425   :  { %v1028_v8 = vpop.f32.mrf.mxu0  ;;  %v1069_v0 = vpop.f32.mrf.mxu1 }
 0x426   :  { %1972 = vpow2.f32 %v1764_v6  ;;  %v1765_v12 = vmul.f32 -1.442695, %v1073_v4  ;;  %v1766_v60 = vmul.f32 -1.442695, %v1075_v17 }
 0x427   :  { %v1029_v61 = vpop.f32.mrf.mxu0  ;;  %v1070_v62 = vpop.f32.mrf.mxu1 }
 0x428   :  { %1974 = vpow2.f32 %v1765_v12 }
 0x429   :  { %1976 = vtanh.f32 %v1074_v18 }
 0x42a   :  { %1978 = vpow2.f32 %v1766_v60 }
 0x433   :  { %v1973_v46 = vpop.eup %1972 }
 0x434   :  { %v1079_v10 = vadd.f32 1.0, %v1973_v46 }
 0x435   :  { %v1975_v14 = vpop.eup %1974 }
 0x436   :  { %1980 = vrcp.f32 %v1079_v10  ;;  %v1085_v9 = vadd.f32 1.0, %v1975_v14  ;;  %v1977_v3 = vpop.eup %1976  ;;  %v2691_v14 = vld [vmem:[#allocation11 + $0xe0] ss:$16 sps:$4 sm:$0xff]  }
 0x437   :  { %v1979_v1 = vpop.eup %1978 }
 0x438   :  { %1982 = vrcp.f32 %v1085_v9  ;;  %v1092_v54 = vadd.f32 1.0, %v1979_v1  ;;  %v2694_v9 = vld [vmem:[#allocation11 + $0xe8] ss:$16 sps:$4 sm:$0xff]   ;;  %v2700_v1 = vld [vmem:[#allocation11 + $0xcc] ss:$16 sps:$4 sm:$0xff]  }
 0x43a   :  { %1984 = vrcp.f32 %v1092_v54  ;;  %v2714_v54 = vld [vmem:[#allocation11 + $0xac] ss:$16 sps:$4 sm:$0xff]  }
 0x443   :  { %v1981_v7 = vpop.eup %1980 }
 0x444   :  { %v1096_v55 = vmul.f32 %v1981_v7, %v1977_v3  ;;  %v2697_v3 = vld [vmem:[#allocation11 + $0xc4] ss:$16 sps:$4 sm:$0xff]   ;;  %v2705_v7 = vld [vmem:[#allocation11 + $0xc0] ss:$16 sps:$4 sm:$0xff]  }
 0x445   :  { %v1983_v37 = vpop.eup %1982 }
 0x446   :  { %v1095_v58 = vmul.f32 %v1983_v37, %v2600_v53  ;;  %v2711_v37 = vld [vmem:[#allocation11 + $0xa4] ss:$16 sps:$4 sm:$0xff]  }
 0x447   :  { %v1985_v5 = vpop.eup %1984 }
 0x448   :  { %v2642_v13 = vadd.f32 %v1096_v55, %v1095_v58  ;;  %v2708_v55 = vld [vmem:[#allocation11 + $0xc8] ss:$16 sps:$4 sm:$0xff]   ;;  %v2717_v58 = vld [vmem:[#allocation11 + $0xa0] ss:$16 sps:$4 sm:$0xff]  }
 0x44a   :  { %1986 = vtanh.f32 %v2642_v13 }
 0x457   :  { %v1987_v19 = vpop.eup %1986 }
 0x458   :  { %v1099_v63 = vmul.f32 %v1987_v19, %v1985_v5  ;;  %v2723_v5 = vld [vmem:[#allocation11 + $0x84] ss:$16 sps:$4 sm:$0xff]   ;;  %v2726_v19 = vld [vmem:[#allocation11 + $0x8c] ss:$16 sps:$4 sm:$0xff]  }
 0x45a   :  { %v1107_v56 = vpack.c.bf16 %v1099_v63, %v1099_v63  ;;  %v2729_v63 = vld [vmem:[#allocation11 + $0x80] ss:$16 sps:$4 sm:$0xff]  }
 0x45c   :  { %1141 = vmatmul.mubr.bf16.vlgmr.msra.gmra.mxu0 %v1107_v56  ;;  %1182 = vmatmul.mubr.bf16.vlgmr.msra.gmra.mxu1 %v1107_v56  ;;  %v2732_v56 = vld [vmem:[#allocation11 + $0x88] ss:$16 sps:$4 sm:$0xff]  }
 0x45d   :  { %1227 = vmatpush1.bf16.msra.mxu0 %v2284_v20  ;;  %1268 = vmatpush1.bf16.msra.mxu1 %v2286_v21  ;;  %v2677_v20 = vld [vmem:[#allocation11 + $0xe4] ss:$16 sps:$4 sm:$0xff]   ;;  %v2680_v21 = vld [vmem:[#allocation11 + $0xec] ss:$16 sps:$4 sm:$0xff]  }
 0x45e   :  { %1228 = vmatprep.subr.bf16.mxu0 %v2288_v22  ;;  %1269 = vmatprep.subr.bf16.mxu1 %v2292_v23 }
 0x45f   :  { %1258 = vmatprep.mubr.bf16.mxu0 %v2842_v57  ;;  %1299 = vmatprep.mubr.bf16.mxu1 %v2842_v57 }
 0x461   :  { %1229 = vmatpush1.bf16.msra.mxu0 %v2296_v24  ;;  %1270 = vmatpush1.bf16.msra.mxu1 %v2300_v25  ;;  %v2848_v24 = vld [vmem:[#allocation24_spill] sm:$0xff] }
 0x462   :  { %1230 = vmatprep.subr.bf16.mxu0 %v2302_v26  ;;  %1271 = vmatprep.subr.bf16.mxu1 %v2306_v27 }
 0x465   :  { %1231 = vmatpush1.bf16.msra.mxu0 %v2310_v29  ;;  %1272 = vmatpush1.bf16.msra.mxu1 %v2312_v30  ;;  %v2849_v30 = vld [vmem:[#allocation26_spill] sm:$0xff] }
 0x466   :  { %1232 = vmatprep.subr.bf16.mxu0 %v2316_v31  ;;  %1273 = vmatprep.subr.bf16.mxu1 %v2320_v32 }
 0x469   :  { %1233 = vmatpush1.bf16.msra.mxu0 %v2324_v33  ;;  %1274 = vmatpush1.bf16.msra.mxu1 %v2328_v34 }
 0x46a   :  { %1234 = vmatprep.subr.bf16.mxu0 %v2332_v35  ;;  %1275 = vmatprep.subr.bf16.mxu1 %v2334_v36 }
 0x46d   :  { %1235 = vmatpush1.bf16.msra.mxu0 %v2338_v38  ;;  %1276 = vmatpush1.bf16.msra.mxu1 %v2342_v39  ;;  %v2850_v38 = vld [vmem:[#allocation27_spill] sm:$0xff] }
 0x46e   :  { %1236 = vmatprep.subr.bf16.mxu0 %v2344_v40  ;;  %1277 = vmatprep.subr.bf16.mxu1 %v2348_v41  ;;  %v2851_v40 = vld [vmem:[#allocation25_spill] sm:$0xff] }
 0x471   :  { %1237 = vmatpush1.bf16.msra.mxu0 %v2354_v42  ;;  %1278 = vmatpush1.bf16.msra.mxu1 %v2356_v43 }
 0x472   :  { %1238 = vmatprep.subr.bf16.mxu0 %v2360_v44  ;;  %1279 = vmatprep.subr.bf16.mxu1 %v2362_v45 }
 0x475   :  { %1239 = vmatpush1.bf16.msra.mxu0 %v2368_v47  ;;  %1280 = vmatpush1.bf16.msra.mxu1 %v2370_v48 }
 0x476   :  { %1240 = vmatprep.subr.bf16.mxu0 %v2374_v49  ;;  %1281 = vmatprep.subr.bf16.mxu1 %v2376_v50 }
 0x479   :  { %1241 = vmatpush1.bf16.msra.mxu0 %v2382_v51  ;;  %1282 = vmatpush1.bf16.msra.mxu1 %v2384_v52 }
 0x47a   :  { %1344 = vmatprep.subr.bf16.mxu0 %v2677_v20  ;;  %1385 = vmatprep.subr.bf16.mxu1 %v2680_v21 }
 0x51c   :  { %v1142_v22 = vpop.f32.mrf.mxu0  ;;  %v1183_v23 = vpop.f32.mrf.mxu1 }
 0x51d   :  { %v1190_v25 = vadd.f32 %v1142_v22, %v2848_v24  ;;  %v1192_v41 = vadd.f32 %v1183_v23, %v2851_v40  ;;  %v2735_v22 = vld [vmem:[#allocation11 + $0x64] ss:$16 sps:$4 sm:$0xff]   ;;  %v2738_v23 = vld [vmem:[#allocation11 + $0x6c] ss:$16 sps:$4 sm:$0xff]   ;;  %v2741_v24 = vld [vmem:[#allocation11 + $0x60] ss:$16 sps:$4 sm:$0xff]  }
 0x51e   :  { %v1144_v26 = vpop.f32.mrf.mxu0  ;;  %v1185_v27 = vpop.f32.mrf.mxu1 }
 0x51f   :  { %v1767_v29 = vmul.f32 -1.442695, %v1190_v25  ;;  %v1191_v31 = vadd.f32 %v1144_v26, %v2849_v30  ;;  %v1193_v39 = vadd.f32 %v1185_v27, %v2850_v38  ;;  %v2744_v25 = vld [vmem:[#allocation11 + $0x68] ss:$16 sps:$4 sm:$0xff]   ;;  %v2747_v26 = vld [vmem:[#allocation11 + $0x44] ss:$16 sps:$4 sm:$0xff]  }
 0x520   :  { %v1146_v32 = vpop.f32.mrf.mxu0  ;;  %v1187_v33 = vpop.f32.mrf.mxu1  ;;  %v2750_v27 = vld [vmem:[#allocation11 + $0x4c] ss:$16 sps:$4 sm:$0xff]  }
 0x521   :  { %1988 = vpow2.f32 %v1767_v29  ;;  %v1768_v34 = vmul.f32 -1.442695, %v1191_v31  ;;  %v1769_v53 = vmul.f32 -1.442695, %v1193_v39 }
 0x522   :  { %v1147_v35 = vpop.f32.mrf.mxu0  ;;  %v1188_v36 = vpop.f32.mrf.mxu1 }
 0x523   :  { %1990 = vpow2.f32 %v1768_v34  ;;  %v2855_v34 = vld [vmem:[#allocation29_spill] sm:$0xff] }
 0x524   :  { %1992 = vtanh.f32 %v1192_v41 }
 0x525   :  { %1994 = vpow2.f32 %v1769_v53 }
 0x52e   :  { %v1989_v11 = vpop.eup %1988 }
 0x52f   :  { %v1197_v6 = vadd.f32 1.0, %v1989_v11 }
 0x530   :  { %v1991_v2 = vpop.eup %1990 }
 0x531   :  { %1996 = vrcp.f32 %v1197_v6  ;;  %v1203_v4 = vadd.f32 1.0, %v1991_v2  ;;  %v1993_v8 = vpop.eup %1992 }
 0x532   :  { %v1995_v0 = vpop.eup %1994 }
 0x533   :  { %1998 = vrcp.f32 %v1203_v4  ;;  %v1210_v59 = vadd.f32 1.0, %v1995_v0 }
 0x535   :  { %2000 = vrcp.f32 %v1210_v59 }
 0x53e   :  { %v1997_v12 = vpop.eup %1996 }
 0x53f   :  { %v1214_v61 = vmul.f32 %v1997_v12, %v1993_v8 }
 0x540   :  { %v1999_v62 = vpop.eup %1998 }
 0x541   :  { %v1213_v17 = vmul.f32 %v1999_v62, %v2642_v13  ;;  %v2720_v13 = vld [vmem:[#allocation11 + $0xa8] ss:$16 sps:$4 sm:$0xff]  }
 0x542   :  { %v2001_v18 = vpop.eup %2000 }
 0x543   :  { %v2688_v16 = vadd.f32 %v1214_v61, %v1213_v17  ;;  %v2075_v17 = vld [vmem:[#allocation11 + $0x48] ss:$16 sps:$4 sm:$0xff]  }
 0x545   :  { %2002 = vtanh.f32 %v2688_v16 }
 0x552   :  { %v2003_v60 = vpop.eup %2002 }
 0x553   :  { %v1217_v46 = vmul.f32 %v2003_v60, %v2001_v18  ;;  %v2077_v18 = vld [vmem:[#allocation11 + $0x2c] ss:$16 sps:$4 sm:$0xff]   ;;  %v2078_v60 = vld [vmem:[#allocation11 + $0x20] ss:$16 sps:$4 sm:$0xff]  }
 0x555   :  { %v1225_v10 = vpack.c.bf16 %v1217_v46, %v1217_v46  ;;  %v2079_v46 = vld [vmem:[#allocation11 + $0x28] ss:$16 sps:$4 sm:$0xff]  }
 0x557   :  { %1259 = vmatmul.mubr.bf16.vlgmr.msra.gmra.mxu0 %v1225_v10  ;;  %1300 = vmatmul.mubr.bf16.vlgmr.msra.gmra.mxu1 %v1225_v10  ;;  %v2080_v10 = vld [vmem:[#allocation11 + $0x4] ss:$16 sps:$4 sm:$0xff]  }
 0x558   :  { %1345 = vmatpush1.bf16.msra.mxu0 %v2691_v14  ;;  %1386 = vmatpush1.bf16.msra.mxu1 %v2694_v9 }
 0x559   :  { %1346 = vmatprep.subr.bf16.mxu0 %v2697_v3  ;;  %1387 = vmatprep.subr.bf16.mxu1 %v2700_v1 }
 0x55a   :  { %1376 = vmatprep.mubr.bf16.mxu0 %v2842_v57  ;;  %1417 = vmatprep.mubr.bf16.mxu1 %v2842_v57 }
 0x55c   :  { %1347 = vmatpush1.bf16.msra.mxu0 %v2705_v7  ;;  %1388 = vmatpush1.bf16.msra.mxu1 %v2708_v55 }
 0x55d   :  { %1348 = vmatprep.subr.bf16.mxu0 %v2711_v37  ;;  %1389 = vmatprep.subr.bf16.mxu1 %v2714_v54 }
 0x560   :  { %1349 = vmatpush1.bf16.msra.mxu0 %v2717_v58  ;;  %1390 = vmatpush1.bf16.msra.mxu1 %v2720_v13 }
 0x561   :  { %1350 = vmatprep.subr.bf16.mxu0 %v2723_v5  ;;  %1391 = vmatprep.subr.bf16.mxu1 %v2726_v19 }
 0x564   :  { %1351 = vmatpush1.bf16.msra.mxu0 %v2729_v63  ;;  %1392 = vmatpush1.bf16.msra.mxu1 %v2732_v56 }
 0x565   :  { %1352 = vmatprep.subr.bf16.mxu0 %v2735_v22  ;;  %1393 = vmatprep.subr.bf16.mxu1 %v2738_v23 }
 0x568   :  { %1353 = vmatpush1.bf16.msra.mxu0 %v2741_v24  ;;  %1394 = vmatpush1.bf16.msra.mxu1 %v2744_v25 }
 0x569   :  { %1354 = vmatprep.subr.bf16.mxu0 %v2747_v26  ;;  %1395 = vmatprep.subr.bf16.mxu1 %v2750_v27 }
 0x56c   :  { %1355 = vmatpush1.bf16.msra.mxu0 %v2354_v42  ;;  %1396 = vmatpush1.bf16.msra.mxu1 %v2356_v43 }
 0x56d   :  { %1356 = vmatprep.subr.bf16.mxu0 %v2360_v44  ;;  %1397 = vmatprep.subr.bf16.mxu1 %v2362_v45  ;;  %v2852_v44 = vld [vmem:[#allocation28_spill] sm:$0xff] }
 0x570   :  { %1357 = vmatpush1.bf16.msra.mxu0 %v2368_v47  ;;  %1398 = vmatpush1.bf16.msra.mxu1 %v2370_v48  ;;  %v2853_v48 = vld [vmem:[#allocation30_spill] sm:$0xff] }
 0x571   :  { %1358 = vmatprep.subr.bf16.mxu0 %v2374_v49  ;;  %1399 = vmatprep.subr.bf16.mxu1 %v2376_v50 }
 0x574   :  { %1359 = vmatpush1.bf16.msra.mxu0 %v2382_v51  ;;  %1400 = vmatpush1.bf16.msra.mxu1 %v2384_v52  ;;  %v2854_v52 = vld [vmem:[#allocation31_spill] sm:$0xff] }
 0x575   :  { %1462 = vmatprep.subr.bf16.mxu0 %v2677_v20  ;;  %1503 = vmatprep.subr.bf16.mxu1 %v2680_v21 }
 0x617   :  { %v1260_v42 = vpop.f32.mrf.mxu0  ;;  %v1301_v43 = vpop.f32.mrf.mxu1 }
 0x618   :  { %v1308_v45 = vadd.f32 %v1260_v42, %v2852_v44  ;;  %v1310_v21 = vadd.f32 %v1301_v43, %v2855_v34 }
 0x619   :  { %v1262_v29 = vpop.f32.mrf.mxu0  ;;  %v1303_v47 = vpop.f32.mrf.mxu1 }
 0x61a   :  { %v1770_v30 = vmul.f32 -1.442695, %v1308_v45  ;;  %v1309_v31 = vadd.f32 %v1262_v29, %v2853_v48  ;;  %v1311_v20 = vadd.f32 %v1303_v47, %v2854_v52 }
 0x61b   :  { %v1264_v49 = vpop.f32.mrf.mxu0  ;;  %v1305_v32 = vpop.f32.mrf.mxu1 }
 0x61c   :  { %2004 = vpow2.f32 %v1770_v30  ;;  %v1771_v50 = vmul.f32 -1.442695, %v1309_v31  ;;  %v1772_v35 = vmul.f32 -1.442695, %v1311_v20 }
 0x61d   :  { %v1265_v51 = vpop.f32.mrf.mxu0  ;;  %v1306_v33 = vpop.f32.mrf.mxu1 }
 0x61e   :  { %2006 = vpow2.f32 %v1771_v50 }
 0x61f   :  { %2008 = vtanh.f32 %v1310_v21 }
 0x620   :  { %2010 = vpow2.f32 %v1772_v35  ;;  %v2225_v35 = vmov 0.0  }
 0x629   :  { %v2005_v36 = vpop.eup %2004 }
 0x62a   :  { %v1315_v38 = vadd.f32 1.0, %v2005_v36  ;;  %v1592_v36 = vld [vmem:[#allocation13 + $0x78] sm:$0xff] }
 0x62b   :  { %v2007_v39 = vpop.eup %2006 }
 0x62c   :  { %2012 = vrcp.f32 %v1315_v38  ;;  %v1321_v40 = vadd.f32 1.0, %v2007_v39  ;;  %v2009_v41 = vpop.eup %2008  ;;  %v1591_v38 = vld [vmem:[#allocation13 + $0x70] sm:$0xff]  ;;  %v1590_v39 = vld [vmem:[#allocation13 + $0x68] sm:$0xff] }
 0x62d   :  { %v2011_v53 = vpop.eup %2010 }
 0x62e   :  { %2014 = vrcp.f32 %v1321_v40  ;;  %v1328_v4 = vadd.f32 1.0, %v2011_v53  ;;  %v1589_v40 = vld [vmem:[#allocation13 + $0x60] sm:$0xff]  ;;  %v1587_v53 = vld [vmem:[#allocation13 + $0x50] sm:$0xff] }
 0x630   :  { %2016 = vrcp.f32 %v1328_v4  ;;  %v1583_v4 = vld [vmem:[#allocation13 + $0x30] sm:$0xff] }
 0x639   :  { %v2013_v11 = vpop.eup %2012 }
 0x63a   :  { %v1332_v6 = vmul.f32 %v2013_v11, %v2009_v41  ;;  %v1588_v41 = vld [vmem:[#allocation13 + $0x58] sm:$0xff]  ;;  %v1586_v11 = vld [vmem:[#allocation13 + $0x48] sm:$0xff] }
 0x63b   :  { %v2015_v2 = vpop.eup %2014 }
 0x63c   :  { %v1331_v8 = vmul.f32 %v2015_v2, %v2688_v16  ;;  %v2076_v16 = vld [vmem:[#allocation11 + $0x24] ss:$16 sps:$4 sm:$0xff]   ;;  %v1584_v2 = vld [vmem:[#allocation13 + $0x38] sm:$0xff] }
 0x63d   :  { %v2017_v12 = vpop.eup %2016 }
 0x63e   :  { %v2770_v0 = vadd.f32 %v1332_v6, %v1331_v8  ;;  %v1585_v6 = vld [vmem:[#allocation13 + $0x40] sm:$0xff]  ;;  %v1582_v8 = vld [vmem:[#allocation13 + $0x28] sm:$0xff] }
 0x640   :  { %2018 = vtanh.f32 %v2770_v0 }
 0x64d   :  { %v2019_v61 = vpop.eup %2018 }
 0x64e   :  { %v1335_v62 = vmul.f32 %v2019_v61, %v2017_v12  ;;  %v1580_v12 = vld [vmem:[#allocation13 + $0x18] sm:$0xff]  ;;  %v1579_v61 = vld [vmem:[#allocation13 + $0x10] sm:$0xff] }
 0x650   :  { %v1343_v59 = vpack.c.bf16 %v1335_v62, %v1335_v62  ;;  %v1578_v62 = vld [vmem:[#allocation13 + $0x8] sm:$0xff] }
 0x652   :  { %1377 = vmatmul.mubr.bf16.vlgmr.msra.gmra.mxu0 %v1343_v59  ;;  %1418 = vmatmul.mubr.bf16.vlgmr.msra.gmra.mxu1 %v1343_v59  ;;  %v1577_v59 = vld [vmem:[#allocation13] sm:$0xff] }
 0x653   :  { %1463 = vmatpush1.bf16.msra.mxu0 %v2691_v14  ;;  %1504 = vmatpush1.bf16.msra.mxu1 %v2694_v9  ;;  %v2081_v14 = vld [vmem:[#allocation11 + $0xc] ss:$16 sps:$4 sm:$0xff]   ;;  %v2082_v9 = vld [vmem:[#allocation11] ss:$16 sps:$4 sm:$0xff]  }
 0x654   :  { %1464 = vmatprep.subr.bf16.mxu0 %v2697_v3  ;;  %1505 = vmatprep.subr.bf16.mxu1 %v2700_v1  ;;  %v2083_v3 = vld [vmem:[#allocation11 + $0x8] ss:$16 sps:$4 sm:$0xff]  }
 0x655   :  { %1494 = vmatprep.mubr.bf16.mxu0 %v2842_v57  ;;  %1535 = vmatprep.mubr.bf16.mxu1 %v2842_v57  ;;  %v2074_v57 = vld [vmem:[#allocation11 + $0x40] ss:$16 sps:$4 sm:$0xff]  }
 0x657   :  { %1465 = vmatpush1.bf16.msra.mxu0 %v2705_v7  ;;  %1506 = vmatpush1.bf16.msra.mxu1 %v2708_v55  ;;  %v2856_v55 = vld [vmem:[#allocation32_spill] sm:$0xff] }
 0x658   :  { %1466 = vmatprep.subr.bf16.mxu0 %v2711_v37  ;;  %1507 = vmatprep.subr.bf16.mxu1 %v2714_v54 }
 0x65b   :  { %1467 = vmatpush1.bf16.msra.mxu0 %v2717_v58  ;;  %1508 = vmatpush1.bf16.msra.mxu1 %v2720_v13 }
 0x65c   :  { %1468 = vmatprep.subr.bf16.mxu0 %v2723_v5  ;;  %1509 = vmatprep.subr.bf16.mxu1 %v2726_v19  ;;  %v2857_v5 = vld [vmem:[#allocation34_spill] sm:$0xff] }
 0x65f   :  { %1469 = vmatpush1.bf16.msra.mxu0 %v2729_v63  ;;  %1510 = vmatpush1.bf16.msra.mxu1 %v2732_v56 }
 0x660   :  { %1470 = vmatprep.subr.bf16.mxu0 %v2735_v22  ;;  %1511 = vmatprep.subr.bf16.mxu1 %v2738_v23 }
 0x663   :  { %1471 = vmatpush1.bf16.msra.mxu0 %v2741_v24  ;;  %1512 = vmatpush1.bf16.msra.mxu1 %v2744_v25  ;;  %v2858_v25 = vld [vmem:[#allocation35_spill] sm:$0xff] }
 0x664   :  { %1472 = vmatprep.subr.bf16.mxu0 %v2747_v26  ;;  %1513 = vmatprep.subr.bf16.mxu1 %v2750_v27  ;;  %v2859_v27 = vld [vmem:[#allocation33_spill] sm:$0xff] }
 0x667   :  { %1473 = vmatpush1.bf16.msra.mxu0 %v2074_v57  ;;  %1514 = vmatpush1.bf16.msra.mxu1 %v2075_v17 }
 0x668   :  { %1474 = vmatprep.subr.bf16.mxu0 %v2076_v16  ;;  %1515 = vmatprep.subr.bf16.mxu1 %v2077_v18  ;;  %v2860_v16 = vld [vmem:[#allocation36_spill] sm:$0xff] }
 0x66b   :  { %1475 = vmatpush1.bf16.msra.mxu0 %v2078_v60  ;;  %1516 = vmatpush1.bf16.msra.mxu1 %v2079_v46 }
 0x66c   :  { %1476 = vmatprep.subr.bf16.mxu0 %v2080_v10  ;;  %1517 = vmatprep.subr.bf16.mxu1 %v2081_v14 }
 0x66f   :  { %1477 = vmatpush1.bf16.msra.mxu0 %v2082_v9  ;;  %1518 = vmatpush1.bf16.msra.mxu1 %v2083_v3 }
 0x670   :  { %1797 = vmatprep.subr.mxu0 %v2225_v35 }
 0x712   :  { %v1378_v1 = vpop.f32.mrf.mxu0  ;;  %v1419_v7 = vpop.f32.mrf.mxu1 }
 0x713   :  { %v1426_v37 = vadd.f32 %v1378_v1, %v2856_v55  ;;  %v1428_v42 = vadd.f32 %v1419_v7, %v2859_v27 }
 0x714   :  { %v1380_v54 = vpop.f32.mrf.mxu0  ;;  %v1421_v58 = vpop.f32.mrf.mxu1 }
 0x715   :  { %v1773_v13 = vmul.f32 -1.442695, %v1426_v37  ;;  %v1427_v19 = vadd.f32 %v1380_v54, %v2857_v5  ;;  %v1429_v26 = vadd.f32 %v1421_v58, %v2858_v25  ;;  %v2861_v54 = vld [vmem:[#allocation37_spill] sm:$0xff] }
 0x716   :  { %v1382_v63 = vpop.f32.mrf.mxu0  ;;  %v1423_v56 = vpop.f32.mrf.mxu1 }
 0x717   :  { %2020 = vpow2.f32 %v1773_v13  ;;  %v1774_v22 = vmul.f32 -1.442695, %v1427_v19  ;;  %v1775_v43 = vmul.f32 -1.442695, %v1429_v26 }
 0x718   :  { %v1383_v23 = vpop.f32.mrf.mxu0  ;;  %v1424_v24 = vpop.f32.mrf.mxu1 }
 0x719   :  { %2022 = vpow2.f32 %v1774_v22 }
 0x71a   :  { %2024 = vtanh.f32 %v1428_v42 }
 0x71b   :  { %2026 = vpow2.f32 %v1775_v43 }
 0x724   :  { %v2021_v44 = vpop.eup %2020 }
 0x725   :  { %v1433_v45 = vadd.f32 1.0, %v2021_v44 }
 0x726   :  { %v2023_v29 = vpop.eup %2022 }
 0x727   :  { %2028 = vrcp.f32 %v1433_v45  ;;  %v1439_v47 = vadd.f32 1.0, %v2023_v29  ;;  %v2025_v30 = vpop.eup %2024  ;;  %v1779_v45 = vld [vmem:[%s2819_s5] ss:$0 sm:$0xff] }
 0x728   :  { %v2027_v48 = vpop.eup %2026 }
 0x729   :  { %2030 = vrcp.f32 %v1439_v47  ;;  %v1446_v50 = vadd.f32 1.0, %v2027_v48 }
 0x72b   :  { %2032 = vrcp.f32 %v1446_v50 }
 0x734   :  { %v2029_v31 = vpop.eup %2028 }
 0x735   :  { %v1450_v49 = vmul.f32 %v2029_v31, %v2025_v30 }
 0x736   :  { %v2031_v32 = vpop.eup %2030 }
 0x737   :  { %v1449_v51 = vmul.f32 %v2031_v32, %v2770_v0  ;;  %v1581_v0 = vld [vmem:[#allocation13 + $0x20] sm:$0xff] }
 0x738   :  { %v2033_v52 = vpop.eup %2032 }
 0x739   :  { %v2800_v33 = vadd.f32 %v1450_v49, %v1449_v51 }
 0x73b   :  { %2034 = vtanh.f32 %v2800_v33 }
 0x748   :  { %v2035_v20 = vpop.eup %2034 }
 0x749   :  { %v1453_v34 = vmul.f32 %v2035_v20, %v2033_v52 }
 0x74b   :  { %v1461_v21 = vpack.c.bf16 %v1453_v34, %v1453_v34 }
 0x74d   :  { %1495 = vmatmul.mubr.bf16.vlgmr.msra.gmra.mxu0 %v1461_v21  ;;  %1536 = vmatmul.mubr.bf16.vlgmr.msra.gmra.mxu1 %v1461_v21 }
 0x74e   :  { %1798 = vmatpush3.msra.mxu0 %v1592_v36  ;;  %1829 = vmatprep.mubr.msk.f32.mxu0 %vm2226_vm1, %v2225_v35 }
 0x74f   :  { %1799 = vmatprep.subr.mxu0 %v2225_v35 }
 0x750   :  { %1800 = vmatpush3.msra.mxu0 %v1591_v38 }
 0x751   :  { %1801 = vmatprep.subr.mxu0 %v2225_v35 }
 0x752   :  { %1802 = vmatpush3.msra.mxu0 %v1590_v39 }
 0x753   :  { %1803 = vmatprep.subr.mxu0 %v2225_v35 }
 0x754   :  { %1804 = vmatpush3.msra.mxu0 %v1589_v40 }
 0x755   :  { %1805 = vmatprep.subr.mxu0 %v2225_v35 }
 0x756   :  { %1806 = vmatpush3.msra.mxu0 %v1588_v41 }
 0x757   :  { %1807 = vmatprep.subr.mxu0 %v2225_v35 }
 0x758   :  { %1808 = vmatpush3.msra.mxu0 %v1587_v53 }
 0x759   :  { %1809 = vmatprep.subr.mxu0 %v2225_v35 }
 0x75a   :  { %1810 = vmatpush3.msra.mxu0 %v1586_v11 }
 0x75b   :  { %1811 = vmatprep.subr.mxu0 %v2225_v35 }
 0x75c   :  { %1812 = vmatpush3.msra.mxu0 %v1585_v6 }
 0x75d   :  { %1813 = vmatprep.subr.mxu0 %v2225_v35 }
 0x75e   :  { %1814 = vmatpush3.msra.mxu0 %v1584_v2 }
 0x75f   :  { %1815 = vmatprep.subr.mxu0 %v2225_v35 }
 0x760   :  { %1816 = vmatpush3.msra.mxu0 %v1583_v4 }
 0x761   :  { %1817 = vmatprep.subr.mxu0 %v2225_v35 }
 0x762   :  { %1818 = vmatpush3.msra.mxu0 %v1582_v8 }
 0x763   :  { %1819 = vmatprep.subr.mxu0 %v2225_v35 }
 0x764   :  { %1820 = vmatpush3.msra.mxu0 %v1581_v0 }
 0x765   :  { %1821 = vmatprep.subr.mxu0 %v2225_v35 }
 0x766   :  { %1822 = vmatpush3.msra.mxu0 %v1580_v12 }
 0x767   :  { %1823 = vmatprep.subr.mxu0 %v2225_v35 }
 0x768   :  { %1824 = vmatpush3.msra.mxu0 %v1579_v61 }
 0x769   :  { %1825 = vmatprep.subr.mxu0 %v2225_v35 }
 0x76a   :  { %1826 = vmatpush3.msra.mxu0 %v1578_v62 }
 0x76b   :  { %1827 = vmatprep.subr.mxu0 %v2225_v35 }
 0x76c   :  { %1828 = vmatpush3.msra.mxu0 %v1577_v59 }
 0x80d   :  { %v1496_v57 = vpop.f32.mrf.mxu0  ;;  %v1537_v17 = vpop.f32.mrf.mxu1 }
 0x80e   :  { %v1544_v18 = vadd.f32 %v1496_v57, %v2860_v16  ;;  %v1546_v58 = vadd.f32 %v1537_v17, %v2861_v54 }
 0x80f   :  { %v1498_v60 = vpop.f32.mrf.mxu0  ;;  %v1539_v46 = vpop.f32.mrf.mxu1 }
 0x810   :  { %v1776_v10 = vmul.f32 -1.442695, %v1544_v18  ;;  %v1545_v14 = vadd.f32 %v1498_v60, %v2506_v15  ;;  %v1547_v37 = vadd.f32 %v1539_v46, %v2509_v28 }
 0x811   :  { %v1500_v9 = vpop.f32.mrf.mxu0  ;;  %v1541_v3 = vpop.f32.mrf.mxu1 }
 0x812   :  { %2036 = vpow2.f32 %v1776_v10  ;;  %v1777_v1 = vmul.f32 -1.442695, %v1545_v14  ;;  %v1778_v13 = vmul.f32 -1.442695, %v1547_v37 }
 0x813   :  { %v1501_v7 = vpop.f32.mrf.mxu0  ;;  %v1542_v55 = vpop.f32.mrf.mxu1 }
 0x814   :  { %2038 = vpow2.f32 %v1777_v1 }
 0x815   :  { %2040 = vtanh.f32 %v1546_v58 }
 0x816   :  { %2042 = vpow2.f32 %v1778_v13 }
 0x81f   :  { %v2037_v5 = vpop.eup %2036 }
 0x820   :  { %v1551_v19 = vadd.f32 1.0, %v2037_v5 }
 0x821   :  { %v2039_v63 = vpop.eup %2038 }
 0x822   :  { %2044 = vrcp.f32 %v1551_v19  ;;  %v1557_v56 = vadd.f32 1.0, %v2039_v63  ;;  %v2041_v15 = vpop.eup %2040 }
 0x823   :  { %v2043_v22 = vpop.eup %2042 }
 0x824   :  { %2046 = vrcp.f32 %v1557_v56  ;;  %v1564_v26 = vadd.f32 1.0, %v2043_v22 }
 0x826   :  { %2048 = vrcp.f32 %v1564_v26 }
 0x82f   :  { %v2045_v23 = vpop.eup %2044 }
 0x830   :  { %v1568_v24 = vmul.f32 %v2045_v23, %v2041_v15 }
 0x831   :  { %v2047_v25 = vpop.eup %2046 }
 0x832   :  { %v1567_v27 = vmul.f32 %v2047_v25, %v2800_v33 }
 0x833   :  { %v2049_v42 = vpop.eup %2048 }
 0x834   :  { %v1569_v28 = vadd.f32 %v1568_v24, %v1567_v27 }
 0x836   :  { %2050 = vtanh.f32 %v1569_v28 }
 0x843   :  { %v2051_v43 = vpop.eup %2050 }
 0x844   :  { %v1571_v44 = vmul.f32 %v2051_v43, %v2049_v42 }
 0x846   :  { %1830 = vmatmul.mubr.f32.vlgmr.msra.gmra.mxu0 %v1571_v44 }
 0x906   :  { %v1666_v29 = vpop.f32.mrf.mxu0 }
 0x907   :  { %v1667_v47 = vadd.f32 %v1779_v45, %v1666_v29 }
 0x908   :  { %v1831_v30 = vpop.f32.mrf.mxu0 }
 0x909   :  { %1670 = vst [vmem:[#allocation14] sm:$0xff] %v1667_v47 }
 0x90a   :  { %2195 = shalt.err (!%p2192_p1)
}
 0x90b   :  { %1680 = dma.vmem_to_hbm [thread:$0]  %s1678_s26, 128, %s2820_s6, [#allocation7]  }
 0x90c   :  { %2210 = dma.done.wait [#allocation7], 128  }
 0x90d   :  { %2211 = vsyncadd [#allocation7], 4294967168 }
 0x90e   :  { %1684 = vsyncpa [#allocation6], 1 }
 0x90f   :  { %1685 = vsyncpa [#allocation9], 1 }
 0x910   :  { %1686 = vsyncpa [#allocation12], 1 }
 0x911   :  { %1687 = vsyncpa [#allocation7], 1 }

</bundles_post_ra>
